<compile_context>
chip_gen: v7x
topology: tpu7x:2x2x1
jax: 0.10.0
libtpu: 0.0.40
codegen_flags: <defaults>
</compile_context>

<pallas_src>
import functools

import jax
import jax.numpy as jnp
from jax.experimental import pallas as pl
from jax.experimental.pallas import tpu as pltpu


# ---------------------------------------------------------------------------
# Fused kernel:  [pre-ReLU] -> depthwise 3x3 (pad 1) -> 1x1 conv + BN affine
#                [+ optional fused skip: pre-ReLU -> 1x1 conv + BN + residual]
# ---------------------------------------------------------------------------
def _fused_sepconv_kernel(*refs, H, W, pre_relu, with_skip, pre_relu_skip):
    if with_skip:
        (x_ref, wdw_ref, wpw_ref, b_ref, wmask_ref,
         xs_ref, ws_ref, bs_ref, o_ref, pad_ref) = refs
    else:
        (x_ref, wdw_ref, wpw_ref, b_ref, wmask_ref, o_ref, pad_ref) = refs

    hw = H * W
    off0 = W + 1                       # start of the image inside the scratch
    cmid = x_ref.shape[1]              # depthwise channel count
    cout = o_ref.shape[1]

    # ---- main-branch input (channels on sublanes, H*W on lanes) -----------
    xin = x_ref[0].astype(jnp.float32)                 # (Cmid, H*W)
    if pre_relu:
        xin = jnp.maximum(xin, 0.0)

    # Zero-padded flat copy in VMEM: handles the H-direction zero padding;
    # the W-direction row wrap-around is killed by the precomputed lane masks.
    pad_ref[...] = jnp.zeros_like(pad_ref)
    pad_ref[:, off0:off0 + hw] = xin

    # ---- depthwise 3x3, stride 1, pad 1: 9 shifted masked VPU FMAs --------
    acc = jnp.zeros((cmid, hw), jnp.float32)
    for dh in (-1, 0, 1):
        for dw in (-1, 0, 1):
            tap = (dh + 1) * 3 + (dw + 1)
            start = off0 + dh * W + dw
            view = pad_ref[:, start:start + hw]        # (Cmid, H*W) tap view
            wcol = wdw_ref[tap]                        # (Cmid, 1) weights
            mrow = wmask_ref[dw + 1]                   # (1, H*W) column mask
            acc = acc + view * (wcol * mrow)

    # ---- pointwise 1x1 conv + folded BatchNorm (VPU broadcast FMAs) -------
    out = jnp.zeros((cout, hw), jnp.float32)
    for ci in range(cmid):
        out = out + wpw_ref[ci] * acc[ci:ci + 1, :]    # (Cout,1)*(1,H*W)
    out = out + b_ref[...]                             # (Cout,1) bias

    # ---- optional fused skip branch: 1x1 conv + BN of relu(block input) ---
    if with_skip:
        cin_s = xs_ref.shape[1]
        xs = xs_ref[0].astype(jnp.float32)             # (Cin, H*W)
        if pre_relu_skip:
            xs = jnp.maximum(xs, 0.0)
        for ci in range(cin_s):
            out = out + ws_ref[ci] * xs[ci:ci + 1, :]
        out = out + bs_ref[...]

    o_ref[0] = out.astype(o_ref.dtype)


def _fused_sepconv_step(x_flat, wdw_k, wpw_k, b_k, wmask_k, *, H, W,
                        pre_relu, skip=None):
    """One rep step of Block: (relu) -> SepConv3x3 -> BN [+ fused skip+add].

    x_flat : (N, Cmid, H*W)          wdw_k : (9, Cmid, 1)
    wpw_k  : (Cmid, Cout, 1)         b_k   : (Cout, 1)
    wmask_k: (3, 1, H*W)             skip  : None or (xs_flat, ws_k, bs_k, pre_relu_skip)
    returns: (N, Cout, H*W)
    """
    n, cmid, hw = x_flat.shape
    cout = wpw_k.shape[1]
    pad_len = hw + 2 * (W + 1)
    with_skip = skip is not None

    kernel = functools.partial(
        _fused_sepconv_kernel, H=H, W=W, pre_relu=pre_relu,
        with_skip=with_skip,
        pre_relu_skip=(skip[3] if with_skip else False))

    inputs = [x_flat, wdw_k, wpw_k, b_k, wmask_k]
    in_specs = [
        pl.BlockSpec((1, cmid, hw), lambda b: (b, 0, 0)),
        pl.BlockSpec((9, cmid, 1), lambda b: (0, 0, 0)),
        pl.BlockSpec((cmid, cout, 1), lambda b: (0, 0, 0)),
        pl.BlockSpec((cout, 1), lambda b: (0, 0)),
        pl.BlockSpec((3, 1, hw), lambda b: (0, 0, 0)),
    ]
    if with_skip:
        xs_flat, ws_k, bs_k, _ = skip
        cin_s = xs_flat.shape[1]
        inputs += [xs_flat, ws_k, bs_k]
        in_specs += [
            pl.BlockSpec((1, cin_s, hw), lambda b: (b, 0, 0)),
            pl.BlockSpec((cin_s, cout, 1), lambda b: (0, 0, 0)),
            pl.BlockSpec((cout, 1), lambda b: (0, 0)),
        ]

    return pl.pallas_call(
        kernel,
        out_shape=jax.ShapeDtypeStruct((n, cout, hw), x_flat.dtype),
        grid_spec=pltpu.PrefetchScalarGridSpec(
            num_scalar_prefetch=0,
            grid=(n,),
            in_specs=in_specs,
            out_specs=pl.BlockSpec((1, cout, hw), lambda b: (b, 0, 0)),
            scratch_shapes=[pltpu.VMEM((cmid, pad_len), jnp.float32)],
        ),
        compiler_params=pltpu.CompilerParams(
            dimension_semantics=("parallel",)),
    )(*inputs)


# ---------------------------------------------------------------------------
# Weight / mask preprocessing (tiny, one-time; done in plain JAX)
# ---------------------------------------------------------------------------
def _fold_bn(w_pw, gamma, beta, mean, var, eps=1e-5):
    # Fold inference-mode BatchNorm into the preceding 1x1 conv.
    scale = gamma / jnp.sqrt(var + eps)                # (Cout,)
    w_eff = w_pw * scale[:, None]                      # (Cout, Cmid)
    b_eff = (beta - mean * scale)[:, None]             # (Cout, 1)
    return w_eff, b_eff


def _dw_to_kernel(w_dw):
    # PyTorch depthwise weight (C, 1, 3, 3) -> (9, C, 1): tap-major, C on sublanes.
    c = w_dw.shape[0]
    return jnp.transpose(w_dw[:, 0].reshape(c, 9), (1, 0))[:, :, None]


def _pw_to_kernel(w_eff):
    # (Cout, Cmid) -> (Cmid, Cout, 1): one (Cout,1) column per input channel.
    return jnp.transpose(w_eff, (1, 0))[:, :, None]


def _make_wmask(h, w):
    # Lane masks (3, 1, H*W) for the dw = -1 / 0 / +1 column taps.
    col = jnp.arange(h * w, dtype=jnp.int32) % w
    left = (col >= 1).astype(jnp.float32)
    mid = jnp.ones((h * w,), jnp.float32)
    right = (col <= w - 2).astype(jnp.float32)
    return jnp.stack([left, mid, right], axis=0)[:, None, :]


# ---------------------------------------------------------------------------
# Block_1 forward (reps=2, grow_first=True, start_with_relu=False, strides=1)
# ---------------------------------------------------------------------------
def block1_forward(x, p):
    n, cin, h, w = x.shape
    hw = h * w
    cout = p["wpw1"].shape[0]

    xf = x.reshape(n, cin, hw)                         # free reshape (no HBM pass)
    wmask = _make_wmask(h, w)

    # rep step 1: relu(x) -> SepConv(Cin->Cout) -> BN1
    w1_eff, b1_eff = _fold_bn(p["wpw1"][:, :, 0, 0], *p["bn1"])
    t = _fused_sepconv_step(
        xf, _dw_to_kernel(p["wdw1"]), _pw_to_kernel(w1_eff), b1_eff, wmask,
        H=h, W=w, pre_relu=True)

    # rep step 2 fused with the skip branch and the residual add:
    #   relu(t) -> SepConv(Cout->Cout) -> BN2   +   BNs(Conv1x1(relu(x)))
    w2_eff, b2_eff = _fold_bn(p["wpw2"][:, :, 0, 0], *p["bn2"])
    ws_eff, bs_eff = _fold_bn(p["wskip"][:, :, 0, 0], *p["bnskip"])
    out = _fused_sepconv_step(
        t, _dw_to_kernel(p["wdw2"]), _pw_to_kernel(w2_eff), b2_eff, wmask,
        H=h, W=w, pre_relu=True,
        skip=(xf, _pw_to_kernel(ws_eff), bs_eff, True))

    return out.reshape(n, cout, h, w)


# ---------------------------------------------------------------------------
# Pure-JAX reference (same semantics, high-precision convs)
# ---------------------------------------------------------------------------
def _conv(x, w, groups=1, pad=0):
    return jax.lax.conv_general_dilated(
        x, w, (1, 1), [(pad, pad), (pad, pad)],
        dimension_numbers=("NCHW", "OIHW", "NCHW"),
        feature_group_count=groups,
        precision=jax.lax.Precision.HIGHEST)


def _bn(x, gamma, beta, mean, var, eps=1e-5):
    s = gamma / jnp.sqrt(var + eps)
    return x * s[None, :, None, None] + (beta - mean * s)[None, :, None, None]


def block1_reference(x, p):
    y0 = jnp.maximum(x, 0.0)
    t = _conv(y0, p["wdw1"], groups=x.shape[1], pad=1)
    t = _conv(t, p["wpw1"])
    t = _bn(t, *p["bn1"])
    t = jnp.maximum(t, 0.0)
    t = _conv(t, p["wdw2"], groups=t.shape[1], pad=1)
    t = _conv(t, p["wpw2"])
    t = _bn(t, *p["bn2"])
    skip = _conv(y0, p["wskip"])
    skip = _bn(skip, *p["bnskip"])
    return t + skip


# ---------------------------------------------------------------------------
if __name__ == "__main__":
    N, CIN, COUT, H, W = 2, 4, 8, 16, 16   # Block_1(in=4, out=8, reps=2)

    key = jax.random.PRNGKey(0)
    ks = jax.random.split(key, 12)

    def bn_params(k, c):
        k1, k2, k3, k4 = jax.random.split(k, 4)
        gamma = 1.0 + 0.1 * jax.random.normal(k1, (c,), jnp.float32)
        beta = 0.1 * jax.random.normal(k2, (c,), jnp.float32)
        mean = 0.1 * jax.random.normal(k3, (c,), jnp.float32)
        var = jax.random.uniform(k4, (c,), jnp.float32, 0.5, 1.5)
        return (gamma, beta, mean, var)

    x = jax.random.normal(ks[0], (N, CIN, H, W), dtype=jnp.float32)

    params = {
        "wdw1": 0.5 * jax.random.normal(ks[1], (CIN, 1, 3, 3), jnp.float32),
        "wpw1": 0.5 * jax.random.normal(ks[2], (COUT, CIN, 1, 1), jnp.float32),
        "bn1": bn_params(ks[3], COUT),
        "wdw2": 0.5 * jax.random.normal(ks[4], (COUT, 1, 3, 3), jnp.float32),
        "wpw2": 0.5 * jax.random.normal(ks[5], (COUT, COUT, 1, 1), jnp.float32),
        "bn2": bn_params(ks[6], COUT),
        "wskip": 0.5 * jax.random.normal(ks[7], (COUT, CIN, 1, 1), jnp.float32),
        "bnskip": bn_params(ks[8], COUT),
    }

    out = jax.jit(block1_forward)(x, params)
    out = jax.block_until_ready(out)

    ref = block1_reference(x, params)
    assert out.shape == ref.shape == (N, COUT, H, W), (out.shape, ref.shape)
    max_err = jnp.max(jnp.abs(out - ref))
    assert jnp.allclose(out, ref, atol=1e-3, rtol=1e-3), f"max |err| = {max_err}"

    print("KERNEL_OK")
</pallas_src>

<mosaic_0001>
module attributes {stable_mosaic.version = 11 : i64} {
  func.func @_fused_sepconv_kernel(%arg0: i32, %arg1: memref<1x4x256xf32, #tpu.memory_space<vmem>>, %arg2: memref<9x4x1xf32, #tpu.memory_space<vmem>>, %arg3: memref<4x8x1xf32, #tpu.memory_space<vmem>>, %arg4: memref<8x1xf32, #tpu.memory_space<vmem>>, %arg5: memref<3x1x256xf32, #tpu.memory_space<vmem>>, %arg6: memref<1x8x256xf32, #tpu.memory_space<vmem>>, %arg7: memref<4x290xf32, #tpu.memory_space<vmem>>) attributes {dimension_semantics = [#tpu.dimension_semantics<parallel>], iteration_bounds = array<i64: 2>, scalar_prefetch = 0 : i64, scratch_operands = 1 : i64, tpu.core_type = #tpu.core_type<tc>, window_params = [{transform_indices = @transform_0, window_bounds = array<i64: 1, 4, 256>}, {pipeline_mode = #tpu.pipeline_mode<synchronous>, transform_indices = @transform_1, window_bounds = array<i64: 9, 4, 1>}, {pipeline_mode = #tpu.pipeline_mode<synchronous>, transform_indices = @transform_2, window_bounds = array<i64: 4, 8, 1>}, {pipeline_mode = #tpu.pipeline_mode<synchronous>, transform_indices = @transform_3, window_bounds = array<i64: 8, 1>}, {pipeline_mode = #tpu.pipeline_mode<synchronous>, transform_indices = @transform_4, window_bounds = array<i64: 3, 1, 256>}, {transform_indices = @transform_5, window_bounds = array<i64: 1, 8, 256>}]} {
    %c0 = arith.constant 0 : index
    %c0_0 = arith.constant 0 : index
    %c0_1 = arith.constant 0 : index
    %0 = vector.load %arg1[%c0, %c0_0, %c0_1] : memref<1x4x256xf32, #tpu.memory_space<vmem>>, vector<1x4x256xf32>
    %1 = vector.shape_cast %0 : vector<1x4x256xf32> to vector<4x256xf32>
    %cst = arith.constant 0.000000e+00 : f32
    %2 = vector.broadcast %cst : f32 to vector<4x256xf32>
    %3 = arith.maximumf %1, %2 : vector<4x256xf32>
    %cst_2 = arith.constant 0.000000e+00 : f32
    %4 = vector.broadcast %cst_2 : f32 to vector<4x290xf32>
    %c0_3 = arith.constant 0 : index
    %c0_4 = arith.constant 0 : index
    %5 = vector.load %arg7[%c0_3, %c0_4] : memref<4x290xf32, #tpu.memory_space<vmem>>, vector<4x290xf32>
    tpu.vector_store %arg7[%c0_3, %c0_4], %4 {strides = array<i32>} : memref<4x290xf32, #tpu.memory_space<vmem>>, vector<4x290xf32>,
    %c0_5 = arith.constant 0 : index
    %c17 = arith.constant 17 : index
    %6 = vector.load %arg7[%c0_5, %c17] : memref<4x290xf32, #tpu.memory_space<vmem>>, vector<4x256xf32>
    tpu.vector_store %arg7[%c0_5, %c17], %3 {strides = array<i32>} : memref<4x290xf32, #tpu.memory_space<vmem>>, vector<4x256xf32>,
    %cst_6 = arith.constant 0.000000e+00 : f32
    %7 = vector.broadcast %cst_6 : f32 to vector<4x256xf32>
    %c0_7 = arith.constant 0 : index
    %c0_8 = arith.constant 0 : index
    %8 = vector.load %arg7[%c0_7, %c0_8] : memref<4x290xf32, #tpu.memory_space<vmem>>, vector<4x256xf32>
    %c0_9 = arith.constant 0 : index
    %c0_10 = arith.constant 0 : index
    %c0_11 = arith.constant 0 : index
    %9 = vector.load %arg2[%c0_9, %c0_10, %c0_11] : memref<9x4x1xf32, #tpu.memory_space<vmem>>, vector<1x4x1xf32>
    %10 = vector.shape_cast %9 : vector<1x4x1xf32> to vector<4x1xf32>
    %c0_12 = arith.constant 0 : index
    %c0_13 = arith.constant 0 : index
    %c0_14 = arith.constant 0 : index
    %11 = vector.load %arg5[%c0_12, %c0_13, %c0_14] : memref<3x1x256xf32, #tpu.memory_space<vmem>>, vector<1x1x256xf32>
    %12 = vector.shape_cast %11 : vector<1x1x256xf32> to vector<1x256xf32>
    %13 = vector.broadcast %10 : vector<4x1xf32> to vector<4x256xf32>
    %14 = vector.broadcast %12 : vector<1x256xf32> to vector<4x256xf32>
    %15 = arith.mulf %13, %14 : vector<4x256xf32>
    %16 = arith.mulf %8, %15 : vector<4x256xf32>
    %17 = arith.addf %7, %16 : vector<4x256xf32>
    %c0_15 = arith.constant 0 : index
    %c1 = arith.constant 1 : index
    %18 = vector.load %arg7[%c0_15, %c1] : memref<4x290xf32, #tpu.memory_space<vmem>>, vector<4x256xf32>
    %c1_16 = arith.constant 1 : index
    %c0_17 = arith.constant 0 : index
    %c0_18 = arith.constant 0 : index
    %19 = vector.load %arg2[%c1_16, %c0_17, %c0_18] : memref<9x4x1xf32, #tpu.memory_space<vmem>>, vector<1x4x1xf32>
    %20 = vector.shape_cast %19 : vector<1x4x1xf32> to vector<4x1xf32>
    %c1_19 = arith.constant 1 : index
    %c0_20 = arith.constant 0 : index
    %c0_21 = arith.constant 0 : index
    %21 = vector.load %arg5[%c1_19, %c0_20, %c0_21] : memref<3x1x256xf32, #tpu.memory_space<vmem>>, vector<1x1x256xf32>
    %22 = vector.shape_cast %21 : vector<1x1x256xf32> to vector<1x256xf32>
    %23 = vector.broadcast %20 : vector<4x1xf32> to vector<4x256xf32>
    %24 = vector.broadcast %22 : vector<1x256xf32> to vector<4x256xf32>
    %25 = arith.mulf %23, %24 : vector<4x256xf32>
    %26 = arith.mulf %18, %25 : vector<4x256xf32>
    %27 = arith.addf %17, %26 : vector<4x256xf32>
    %c0_22 = arith.constant 0 : index
    %c2 = arith.constant 2 : index
    %28 = vector.load %arg7[%c0_22, %c2] : memref<4x290xf32, #tpu.memory_space<vmem>>, vector<4x256xf32>
    %c2_23 = arith.constant 2 : index
    %c0_24 = arith.constant 0 : index
    %c0_25 = arith.constant 0 : index
    %29 = vector.load %arg2[%c2_23, %c0_24, %c0_25] : memref<9x4x1xf32, #tpu.memory_space<vmem>>, vector<1x4x1xf32>
    %30 = vector.shape_cast %29 : vector<1x4x1xf32> to vector<4x1xf32>
    %c2_26 = arith.constant 2 : index
    %c0_27 = arith.constant 0 : index
    %c0_28 = arith.constant 0 : index
    %31 = vector.load %arg5[%c2_26, %c0_27, %c0_28] : memref<3x1x256xf32, #tpu.memory_space<vmem>>, vector<1x1x256xf32>
    %32 = vector.shape_cast %31 : vector<1x1x256xf32> to vector<1x256xf32>
    %33 = vector.broadcast %30 : vector<4x1xf32> to vector<4x256xf32>
    %34 = vector.broadcast %32 : vector<1x256xf32> to vector<4x256xf32>
    %35 = arith.mulf %33, %34 : vector<4x256xf32>
    %36 = arith.mulf %28, %35 : vector<4x256xf32>
    %37 = arith.addf %27, %36 : vector<4x256xf32>
    %c0_29 = arith.constant 0 : index
    %c16 = arith.constant 16 : index
    %38 = vector.load %arg7[%c0_29, %c16] : memref<4x290xf32, #tpu.memory_space<vmem>>, vector<4x256xf32>
    %c3 = arith.constant 3 : index
    %c0_30 = arith.constant 0 : index
    %c0_31 = arith.constant 0 : index
    %39 = vector.load %arg2[%c3, %c0_30, %c0_31] : memref<9x4x1xf32, #tpu.memory_space<vmem>>, vector<1x4x1xf32>
    %40 = vector.shape_cast %39 : vector<1x4x1xf32> to vector<4x1xf32>
    %c0_32 = arith.constant 0 : index
    %c0_33 = arith.constant 0 : index
    %c0_34 = arith.constant 0 : index
    %41 = vector.load %arg5[%c0_32, %c0_33, %c0_34] : memref<3x1x256xf32, #tpu.memory_space<vmem>>, vector<1x1x256xf32>
    %42 = vector.shape_cast %41 : vector<1x1x256xf32> to vector<1x256xf32>
    %43 = vector.broadcast %40 : vector<4x1xf32> to vector<4x256xf32>
    %44 = vector.broadcast %42 : vector<1x256xf32> to vector<4x256xf32>
    %45 = arith.mulf %43, %44 : vector<4x256xf32>
    %46 = arith.mulf %38, %45 : vector<4x256xf32>
    %47 = arith.addf %37, %46 : vector<4x256xf32>
    %c0_35 = arith.constant 0 : index
    %c17_36 = arith.constant 17 : index
    %48 = vector.load %arg7[%c0_35, %c17_36] : memref<4x290xf32, #tpu.memory_space<vmem>>, vector<4x256xf32>
    %c4 = arith.constant 4 : index
    %c0_37 = arith.constant 0 : index
    %c0_38 = arith.constant 0 : index
    %49 = vector.load %arg2[%c4, %c0_37, %c0_38] : memref<9x4x1xf32, #tpu.memory_space<vmem>>, vector<1x4x1xf32>
    %50 = vector.shape_cast %49 : vector<1x4x1xf32> to vector<4x1xf32>
    %c1_39 = arith.constant 1 : index
    %c0_40 = arith.constant 0 : index
    %c0_41 = arith.constant 0 : index
    %51 = vector.load %arg5[%c1_39, %c0_40, %c0_41] : memref<3x1x256xf32, #tpu.memory_space<vmem>>, vector<1x1x256xf32>
    %52 = vector.shape_cast %51 : vector<1x1x256xf32> to vector<1x256xf32>
    %53 = vector.broadcast %50 : vector<4x1xf32> to vector<4x256xf32>
    %54 = vector.broadcast %52 : vector<1x256xf32> to vector<4x256xf32>
    %55 = arith.mulf %53, %54 : vector<4x256xf32>
    %56 = arith.mulf %48, %55 : vector<4x256xf32>
    %57 = arith.addf %47, %56 : vector<4x256xf32>
    %c0_42 = arith.constant 0 : index
    %c18 = arith.constant 18 : index
    %58 = vector.load %arg7[%c0_42, %c18] : memref<4x290xf32, #tpu.memory_space<vmem>>, vector<4x256xf32>
    %c5 = arith.constant 5 : index
    %c0_43 = arith.constant 0 : index
    %c0_44 = arith.constant 0 : index
    %59 = vector.load %arg2[%c5, %c0_43, %c0_44] : memref<9x4x1xf32, #tpu.memory_space<vmem>>, vector<1x4x1xf32>
    %60 = vector.shape_cast %59 : vector<1x4x1xf32> to vector<4x1xf32>
    %c2_45 = arith.constant 2 : index
    %c0_46 = arith.constant 0 : index
    %c0_47 = arith.constant 0 : index
    %61 = vector.load %arg5[%c2_45, %c0_46, %c0_47] : memref<3x1x256xf32, #tpu.memory_space<vmem>>, vector<1x1x256xf32>
    %62 = vector.shape_cast %61 : vector<1x1x256xf32> to vector<1x256xf32>
    %63 = vector.broadcast %60 : vector<4x1xf32> to vector<4x256xf32>
    %64 = vector.broadcast %62 : vector<1x256xf32> to vector<4x256xf32>
    %65 = arith.mulf %63, %64 : vector<4x256xf32>
    %66 = arith.mulf %58, %65 : vector<4x256xf32>
    %67 = arith.addf %57, %66 : vector<4x256xf32>
    %c0_48 = arith.constant 0 : index
    %c32 = arith.constant 32 : index
    %68 = vector.load %arg7[%c0_48, %c32] : memref<4x290xf32, #tpu.memory_space<vmem>>, vector<4x256xf32>
    %c6 = arith.constant 6 : index
    %c0_49 = arith.constant 0 : index
    %c0_50 = arith.constant 0 : index
    %69 = vector.load %arg2[%c6, %c0_49, %c0_50] : memref<9x4x1xf32, #tpu.memory_space<vmem>>, vector<1x4x1xf32>
    %70 = vector.shape_cast %69 : vector<1x4x1xf32> to vector<4x1xf32>
    %c0_51 = arith.constant 0 : index
    %c0_52 = arith.constant 0 : index
    %c0_53 = arith.constant 0 : index
    %71 = vector.load %arg5[%c0_51, %c0_52, %c0_53] : memref<3x1x256xf32, #tpu.memory_space<vmem>>, vector<1x1x256xf32>
    %72 = vector.shape_cast %71 : vector<1x1x256xf32> to vector<1x256xf32>
    %73 = vector.broadcast %70 : vector<4x1xf32> to vector<4x256xf32>
    %74 = vector.broadcast %72 : vector<1x256xf32> to vector<4x256xf32>
    %75 = arith.mulf %73, %74 : vector<4x256xf32>
    %76 = arith.mulf %68, %75 : vector<4x256xf32>
    %77 = arith.addf %67, %76 : vector<4x256xf32>
    %c0_54 = arith.constant 0 : index
    %c33 = arith.constant 33 : index
    %78 = vector.load %arg7[%c0_54, %c33] : memref<4x290xf32, #tpu.memory_space<vmem>>, vector<4x256xf32>
    %c7 = arith.constant 7 : index
    %c0_55 = arith.constant 0 : index
    %c0_56 = arith.constant 0 : index
    %79 = vector.load %arg2[%c7, %c0_55, %c0_56] : memref<9x4x1xf32, #tpu.memory_space<vmem>>, vector<1x4x1xf32>
    %80 = vector.shape_cast %79 : vector<1x4x1xf32> to vector<4x1xf32>
    %c1_57 = arith.constant 1 : index
    %c0_58 = arith.constant 0 : index
    %c0_59 = arith.constant 0 : index
    %81 = vector.load %arg5[%c1_57, %c0_58, %c0_59] : memref<3x1x256xf32, #tpu.memory_space<vmem>>, vector<1x1x256xf32>
    %82 = vector.shape_cast %81 : vector<1x1x256xf32> to vector<1x256xf32>
    %83 = vector.broadcast %80 : vector<4x1xf32> to vector<4x256xf32>
    %84 = vector.broadcast %82 : vector<1x256xf32> to vector<4x256xf32>
    %85 = arith.mulf %83, %84 : vector<4x256xf32>
    %86 = arith.mulf %78, %85 : vector<4x256xf32>
    %87 = arith.addf %77, %86 : vector<4x256xf32>
    %c0_60 = arith.constant 0 : index
    %c34 = arith.constant 34 : index
    %88 = vector.load %arg7[%c0_60, %c34] : memref<4x290xf32, #tpu.memory_space<vmem>>, vector<4x256xf32>
    %c8 = arith.constant 8 : index
    %c0_61 = arith.constant 0 : index
    %c0_62 = arith.constant 0 : index
    %89 = vector.load %arg2[%c8, %c0_61, %c0_62] : memref<9x4x1xf32, #tpu.memory_space<vmem>>, vector<1x4x1xf32>
    %90 = vector.shape_cast %89 : vector<1x4x1xf32> to vector<4x1xf32>
    %c2_63 = arith.constant 2 : index
    %c0_64 = arith.constant 0 : index
    %c0_65 = arith.constant 0 : index
    %91 = vector.load %arg5[%c2_63, %c0_64, %c0_65] : memref<3x1x256xf32, #tpu.memory_space<vmem>>, vector<1x1x256xf32>
    %92 = vector.shape_cast %91 : vector<1x1x256xf32> to vector<1x256xf32>
    %93 = vector.broadcast %90 : vector<4x1xf32> to vector<4x256xf32>
    %94 = vector.broadcast %92 : vector<1x256xf32> to vector<4x256xf32>
    %95 = arith.mulf %93, %94 : vector<4x256xf32>
    %96 = arith.mulf %88, %95 : vector<4x256xf32>
    %97 = arith.addf %87, %96 : vector<4x256xf32>
    %cst_66 = arith.constant 0.000000e+00 : f32
    %98 = vector.broadcast %cst_66 : f32 to vector<8x256xf32>
    %c0_67 = arith.constant 0 : index
    %c0_68 = arith.constant 0 : index
    %c0_69 = arith.constant 0 : index
    %99 = vector.load %arg3[%c0_67, %c0_68, %c0_69] : memref<4x8x1xf32, #tpu.memory_space<vmem>>, vector<1x8x1xf32>
    %100 = vector.shape_cast %99 : vector<1x8x1xf32> to vector<8x1xf32>
    %101 = vector.extract_strided_slice %97 {offsets = [0, 0], sizes = [1, 256], strides = [1, 1]} : vector<4x256xf32> to vector<1x256xf32>
    %102 = vector.broadcast %100 : vector<8x1xf32> to vector<8x256xf32>
    %103 = vector.broadcast %101 : vector<1x256xf32> to vector<8x256xf32>
    %104 = arith.mulf %102, %103 : vector<8x256xf32>
    %105 = arith.addf %98, %104 : vector<8x256xf32>
    %c1_70 = arith.constant 1 : index
    %c0_71 = arith.constant 0 : index
    %c0_72 = arith.constant 0 : index
    %106 = vector.load %arg3[%c1_70, %c0_71, %c0_72] : memref<4x8x1xf32, #tpu.memory_space<vmem>>, vector<1x8x1xf32>
    %107 = vector.shape_cast %106 : vector<1x8x1xf32> to vector<8x1xf32>
    %108 = vector.extract_strided_slice %97 {offsets = [1, 0], sizes = [1, 256], strides = [1, 1]} : vector<4x256xf32> to vector<1x256xf32>
    %109 = vector.broadcast %107 : vector<8x1xf32> to vector<8x256xf32>
    %110 = vector.broadcast %108 : vector<1x256xf32> to vector<8x256xf32>
    %111 = arith.mulf %109, %110 : vector<8x256xf32>
    %112 = arith.addf %105, %111 : vector<8x256xf32>
    %c2_73 = arith.constant 2 : index
    %c0_74 = arith.constant 0 : index
    %c0_75 = arith.constant 0 : index
    %113 = vector.load %arg3[%c2_73, %c0_74, %c0_75] : memref<4x8x1xf32, #tpu.memory_space<vmem>>, vector<1x8x1xf32>
    %114 = vector.shape_cast %113 : vector<1x8x1xf32> to vector<8x1xf32>
    %115 = vector.extract_strided_slice %97 {offsets = [2, 0], sizes = [1, 256], strides = [1, 1]} : vector<4x256xf32> to vector<1x256xf32>
    %116 = vector.broadcast %114 : vector<8x1xf32> to vector<8x256xf32>
    %117 = vector.broadcast %115 : vector<1x256xf32> to vector<8x256xf32>
    %118 = arith.mulf %116, %117 : vector<8x256xf32>
    %119 = arith.addf %112, %118 : vector<8x256xf32>
    %c3_76 = arith.constant 3 : index
    %c0_77 = arith.constant 0 : index
    %c0_78 = arith.constant 0 : index
    %120 = vector.load %arg3[%c3_76, %c0_77, %c0_78] : memref<4x8x1xf32, #tpu.memory_space<vmem>>, vector<1x8x1xf32>
    %121 = vector.shape_cast %120 : vector<1x8x1xf32> to vector<8x1xf32>
    %122 = vector.extract_strided_slice %97 {offsets = [3, 0], sizes = [1, 256], strides = [1, 1]} : vector<4x256xf32> to vector<1x256xf32>
    %123 = vector.broadcast %121 : vector<8x1xf32> to vector<8x256xf32>
    %124 = vector.broadcast %122 : vector<1x256xf32> to vector<8x256xf32>
    %125 = arith.mulf %123, %124 : vector<8x256xf32>
    %126 = arith.addf %119, %125 : vector<8x256xf32>
    %c0_79 = arith.constant 0 : index
    %c0_80 = arith.constant 0 : index
    %127 = vector.load %arg4[%c0_79, %c0_80] : memref<8x1xf32, #tpu.memory_space<vmem>>, vector<8x1xf32>
    %128 = vector.broadcast %127 : vector<8x1xf32> to vector<8x256xf32>
    %129 = arith.addf %126, %128 : vector<8x256xf32>
    %c0_81 = arith.constant 0 : index
    %c0_82 = arith.constant 0 : index
    %c0_83 = arith.constant 0 : index
    %130 = vector.load %arg6[%c0_81, %c0_82, %c0_83] : memref<1x8x256xf32, #tpu.memory_space<vmem>>, vector<1x8x256xf32>
    %131 = vector.shape_cast %130 : vector<1x8x256xf32> to vector<8x256xf32>
    %132 = vector.shape_cast %129 : vector<8x256xf32> to vector<1x8x256xf32>
    tpu.vector_store %arg6[%c0_81, %c0_82, %c0_83], %132 {strides = array<i32>} : memref<1x8x256xf32, #tpu.memory_space<vmem>>, vector<1x8x256xf32>,
    return
  }
  func.func @transform_0(%arg0: i32) -> (i32, i32, i32) {
    %c0_i32 = arith.constant 0 : i32
    %c0_i32_0 = arith.constant 0 : i32
    %c0_i32_1 = arith.constant 0 : i32
    return %arg0, %c0_i32, %c0_i32_0 : i32, i32, i32
  }
  func.func @transform_1(%arg0: i32) -> (i32, i32, i32) {
    %c0_i32 = arith.constant 0 : i32
    %c0_i32_0 = arith.constant 0 : i32
    %c0_i32_1 = arith.constant 0 : i32
    %c0_i32_2 = arith.constant 0 : i32
    return %c0_i32, %c0_i32_0, %c0_i32_1 : i32, i32, i32
  }
  func.func @transform_2(%arg0: i32) -> (i32, i32, i32) {
    %c0_i32 = arith.constant 0 : i32
    %c0_i32_0 = arith.constant 0 : i32
    %c0_i32_1 = arith.constant 0 : i32
    %c0_i32_2 = arith.constant 0 : i32
    return %c0_i32, %c0_i32_0, %c0_i32_1 : i32, i32, i32
  }
  func.func @transform_3(%arg0: i32) -> (i32, i32) {
    %c0_i32 = arith.constant 0 : i32
    %c0_i32_0 = arith.constant 0 : i32
    %c0_i32_1 = arith.constant 0 : i32
    return %c0_i32, %c0_i32_0 : i32, i32
  }
  func.func @transform_4(%arg0: i32) -> (i32, i32, i32) {
    %c0_i32 = arith.constant 0 : i32
    %c0_i32_0 = arith.constant 0 : i32
    %c0_i32_1 = arith.constant 0 : i32
    %c0_i32_2 = arith.constant 0 : i32
    return %c0_i32, %c0_i32_0, %c0_i32_1 : i32, i32, i32
  }
  func.func @transform_5(%arg0: i32) -> (i32, i32, i32) {
    %c0_i32 = arith.constant 0 : i32
    %c0_i32_0 = arith.constant 0 : i32
    %c0_i32_1 = arith.constant 0 : i32
    return %arg0, %c0_i32, %c0_i32_0 : i32, i32, i32
  }
}

module attributes {stable_mosaic.version = 11 : i64} {
  func.func @_fused_sepconv_kernel(%arg0: i32, %arg1: memref<1x8x256xf32, #tpu.memory_space<vmem>>, %arg2: memref<9x8x1xf32, #tpu.memory_space<vmem>>, %arg3: memref<8x8x1xf32, #tpu.memory_space<vmem>>, %arg4: memref<8x1xf32, #tpu.memory_space<vmem>>, %arg5: memref<3x1x256xf32, #tpu.memory_space<vmem>>, %arg6: memref<1x4x256xf32, #tpu.memory_space<vmem>>, %arg7: memref<4x8x1xf32, #tpu.memory_space<vmem>>, %arg8: memref<8x1xf32, #tpu.memory_space<vmem>>, %arg9: memref<1x8x256xf32, #tpu.memory_space<vmem>>, %arg10: memref<8x290xf32, #tpu.memory_space<vmem>>) attributes {dimension_semantics = [#tpu.dimension_semantics<parallel>], iteration_bounds = array<i64: 2>, scalar_prefetch = 0 : i64, scratch_operands = 1 : i64, tpu.core_type = #tpu.core_type<tc>, window_params = [{transform_indices = @transform_0, window_bounds = array<i64: 1, 8, 256>}, {pipeline_mode = #tpu.pipeline_mode<synchronous>, transform_indices = @transform_1, window_bounds = array<i64: 9, 8, 1>}, {pipeline_mode = #tpu.pipeline_mode<synchronous>, transform_indices = @transform_2, window_bounds = array<i64: 8, 8, 1>}, {pipeline_mode = #tpu.pipeline_mode<synchronous>, transform_indices = @transform_3, window_bounds = array<i64: 8, 1>}, {pipeline_mode = #tpu.pipeline_mode<synchronous>, transform_indices = @transform_4, window_bounds = array<i64: 3, 1, 256>}, {transform_indices = @transform_5, window_bounds = array<i64: 1, 4, 256>}, {pipeline_mode = #tpu.pipeline_mode<synchronous>, transform_indices = @transform_6, window_bounds = array<i64: 4, 8, 1>}, {pipeline_mode = #tpu.pipeline_mode<synchronous>, transform_indices = @transform_7, window_bounds = array<i64: 8, 1>}, {transform_indices = @transform_8, window_bounds = array<i64: 1, 8, 256>}]} {
    %c0 = arith.constant 0 : index
    %c0_0 = arith.constant 0 : index
    %c0_1 = arith.constant 0 : index
    %0 = vector.load %arg1[%c0, %c0_0, %c0_1] : memref<1x8x256xf32, #tpu.memory_space<vmem>>, vector<1x8x256xf32>
    %1 = vector.shape_cast %0 : vector<1x8x256xf32> to vector<8x256xf32>
    %cst = arith.constant 0.000000e+00 : f32
    %2 = vector.broadcast %cst : f32 to vector<8x256xf32>
    %3 = arith.maximumf %1, %2 : vector<8x256xf32>
    %cst_2 = arith.constant 0.000000e+00 : f32
    %4 = vector.broadcast %cst_2 : f32 to vector<8x290xf32>
    %c0_3 = arith.constant 0 : index
    %c0_4 = arith.constant 0 : index
    %5 = vector.load %arg10[%c0_3, %c0_4] : memref<8x290xf32, #tpu.memory_space<vmem>>, vector<8x290xf32>
    tpu.vector_store %arg10[%c0_3, %c0_4], %4 {strides = array<i32>} : memref<8x290xf32, #tpu.memory_space<vmem>>, vector<8x290xf32>,
    %c0_5 = arith.constant 0 : index
    %c17 = arith.constant 17 : index
    %6 = vector.load %arg10[%c0_5, %c17] : memref<8x290xf32, #tpu.memory_space<vmem>>, vector<8x256xf32>
    tpu.vector_store %arg10[%c0_5, %c17], %3 {strides = array<i32>} : memref<8x290xf32, #tpu.memory_space<vmem>>, vector<8x256xf32>,
    %cst_6 = arith.constant 0.000000e+00 : f32
    %7 = vector.broadcast %cst_6 : f32 to vector<8x256xf32>
    %c0_7 = arith.constant 0 : index
    %c0_8 = arith.constant 0 : index
    %8 = vector.load %arg10[%c0_7, %c0_8] : memref<8x290xf32, #tpu.memory_space<vmem>>, vector<8x256xf32>
    %c0_9 = arith.constant 0 : index
    %c0_10 = arith.constant 0 : index
    %c0_11 = arith.constant 0 : index
    %9 = vector.load %arg2[%c0_9, %c0_10, %c0_11] : memref<9x8x1xf32, #tpu.memory_space<vmem>>, vector<1x8x1xf32>
    %10 = vector.shape_cast %9 : vector<1x8x1xf32> to vector<8x1xf32>
    %c0_12 = arith.constant 0 : index
    %c0_13 = arith.constant 0 : index
    %c0_14 = arith.constant 0 : index
    %11 = vector.load %arg5[%c0_12, %c0_13, %c0_14] : memref<3x1x256xf32, #tpu.memory_space<vmem>>, vector<1x1x256xf32>
    %12 = vector.shape_cast %11 : vector<1x1x256xf32> to vector<1x256xf32>
    %13 = vector.broadcast %10 : vector<8x1xf32> to vector<8x256xf32>
    %14 = vector.broadcast %12 : vector<1x256xf32> to vector<8x256xf32>
    %15 = arith.mulf %13, %14 : vector<8x256xf32>
    %16 = arith.mulf %8, %15 : vector<8x256xf32>
    %17 = arith.addf %7, %16 : vector<8x256xf32>
    %c0_15 = arith.constant 0 : index
    %c1 = arith.constant 1 : index
    %18 = vector.load %arg10[%c0_15, %c1] : memref<8x290xf32, #tpu.memory_space<vmem>>, vector<8x256xf32>
    %c1_16 = arith.constant 1 : index
    %c0_17 = arith.constant 0 : index
    %c0_18 = arith.constant 0 : index
    %19 = vector.load %arg2[%c1_16, %c0_17, %c0_18] : memref<9x8x1xf32, #tpu.memory_space<vmem>>, vector<1x8x1xf32>
    %20 = vector.shape_cast %19 : vector<1x8x1xf32> to vector<8x1xf32>
    %c1_19 = arith.constant 1 : index
    %c0_20 = arith.constant 0 : index
    %c0_21 = arith.constant 0 : index
    %21 = vector.load %arg5[%c1_19, %c0_20, %c0_21] : memref<3x1x256xf32, #tpu.memory_space<vmem>>, vector<1x1x256xf32>
    %22 = vector.shape_cast %21 : vector<1x1x256xf32> to vector<1x256xf32>
    %23 = vector.broadcast %20 : vector<8x1xf32> to vector<8x256xf32>
    %24 = vector.broadcast %22 : vector<1x256xf32> to vector<8x256xf32>
    %25 = arith.mulf %23, %24 : vector<8x256xf32>
    %26 = arith.mulf %18, %25 : vector<8x256xf32>
    %27 = arith.addf %17, %26 : vector<8x256xf32>
    %c0_22 = arith.constant 0 : index
    %c2 = arith.constant 2 : index
    %28 = vector.load %arg10[%c0_22, %c2] : memref<8x290xf32, #tpu.memory_space<vmem>>, vector<8x256xf32>
    %c2_23 = arith.constant 2 : index
    %c0_24 = arith.constant 0 : index
    %c0_25 = arith.constant 0 : index
    %29 = vector.load %arg2[%c2_23, %c0_24, %c0_25] : memref<9x8x1xf32, #tpu.memory_space<vmem>>, vector<1x8x1xf32>
    %30 = vector.shape_cast %29 : vector<1x8x1xf32> to vector<8x1xf32>
    %c2_26 = arith.constant 2 : index
    %c0_27 = arith.constant 0 : index
    %c0_28 = arith.constant 0 : index
    %31 = vector.load %arg5[%c2_26, %c0_27, %c0_28] : memref<3x1x256xf32, #tpu.memory_space<vmem>>, vector<1x1x256xf32>
    %32 = vector.shape_cast %31 : vector<1x1x256xf32> to vector<1x256xf32>
    %33 = vector.broadcast %30 : vector<8x1xf32> to vector<8x256xf32>
    %34 = vector.broadcast %32 : vector<1x256xf32> to vector<8x256xf32>
    %35 = arith.mulf %33, %34 : vector<8x256xf32>
    %36 = arith.mulf %28, %35 : vector<8x256xf32>
    %37 = arith.addf %27, %36 : vector<8x256xf32>
    %c0_29 = arith.constant 0 : index
    %c16 = arith.constant 16 : index
    %38 = vector.load %arg10[%c0_29, %c16] : memref<8x290xf32, #tpu.memory_space<vmem>>, vector<8x256xf32>
    %c3 = arith.constant 3 : index
    %c0_30 = arith.constant 0 : index
    %c0_31 = arith.constant 0 : index
    %39 = vector.load %arg2[%c3, %c0_30, %c0_31] : memref<9x8x1xf32, #tpu.memory_space<vmem>>, vector<1x8x1xf32>
    %40 = vector.shape_cast %39 : vector<1x8x1xf32> to vector<8x1xf32>
    %c0_32 = arith.constant 0 : index
    %c0_33 = arith.constant 0 : index
    %c0_34 = arith.constant 0 : index
    %41 = vector.load %arg5[%c0_32, %c0_33, %c0_34] : memref<3x1x256xf32, #tpu.memory_space<vmem>>, vector<1x1x256xf32>
    %42 = vector.shape_cast %41 : vector<1x1x256xf32> to vector<1x256xf32>
    %43 = vector.broadcast %40 : vector<8x1xf32> to vector<8x256xf32>
    %44 = vector.broadcast %42 : vector<1x256xf32> to vector<8x256xf32>
    %45 = arith.mulf %43, %44 : vector<8x256xf32>
    %46 = arith.mulf %38, %45 : vector<8x256xf32>
    %47 = arith.addf %37, %46 : vector<8x256xf32>
    %c0_35 = arith.constant 0 : index
    %c17_36 = arith.constant 17 : index
    %48 = vector.load %arg10[%c0_35, %c17_36] : memref<8x290xf32, #tpu.memory_space<vmem>>, vector<8x256xf32>
    %c4 = arith.constant 4 : index
    %c0_37 = arith.constant 0 : index
    %c0_38 = arith.constant 0 : index
    %49 = vector.load %arg2[%c4, %c0_37, %c0_38] : memref<9x8x1xf32, #tpu.memory_space<vmem>>, vector<1x8x1xf32>
    %50 = vector.shape_cast %49 : vector<1x8x1xf32> to vector<8x1xf32>
    %c1_39 = arith.constant 1 : index
    %c0_40 = arith.constant 0 : index
    %c0_41 = arith.constant 0 : index
    %51 = vector.load %arg5[%c1_39, %c0_40, %c0_41] : memref<3x1x256xf32, #tpu.memory_space<vmem>>, vector<1x1x256xf32>
    %52 = vector.shape_cast %51 : vector<1x1x256xf32> to vector<1x256xf32>
    %53 = vector.broadcast %50 : vector<8x1xf32> to vector<8x256xf32>
    %54 = vector.broadcast %52 : vector<1x256xf32> to vector<8x256xf32>
    %55 = arith.mulf %53, %54 : vector<8x256xf32>
    %56 = arith.mulf %48, %55 : vector<8x256xf32>
    %57 = arith.addf %47, %56 : vector<8x256xf32>
    %c0_42 = arith.constant 0 : index
    %c18 = arith.constant 18 : index
    %58 = vector.load %arg10[%c0_42, %c18] : memref<8x290xf32, #tpu.memory_space<vmem>>, vector<8x256xf32>
    %c5 = arith.constant 5 : index
    %c0_43 = arith.constant 0 : index
    %c0_44 = arith.constant 0 : index
    %59 = vector.load %arg2[%c5, %c0_43, %c0_44] : memref<9x8x1xf32, #tpu.memory_space<vmem>>, vector<1x8x1xf32>
    %60 = vector.shape_cast %59 : vector<1x8x1xf32> to vector<8x1xf32>
    %c2_45 = arith.constant 2 : index
    %c0_46 = arith.constant 0 : index
    %c0_47 = arith.constant 0 : index
    %61 = vector.load %arg5[%c2_45, %c0_46, %c0_47] : memref<3x1x256xf32, #tpu.memory_space<vmem>>, vector<1x1x256xf32>
    %62 = vector.shape_cast %61 : vector<1x1x256xf32> to vector<1x256xf32>
    %63 = vector.broadcast %60 : vector<8x1xf32> to vector<8x256xf32>
    %64 = vector.broadcast %62 : vector<1x256xf32> to vector<8x256xf32>
    %65 = arith.mulf %63, %64 : vector<8x256xf32>
    %66 = arith.mulf %58, %65 : vector<8x256xf32>
    %67 = arith.addf %57, %66 : vector<8x256xf32>
    %c0_48 = arith.constant 0 : index
    %c32 = arith.constant 32 : index
    %68 = vector.load %arg10[%c0_48, %c32] : memref<8x290xf32, #tpu.memory_space<vmem>>, vector<8x256xf32>
    %c6 = arith.constant 6 : index
    %c0_49 = arith.constant 0 : index
    %c0_50 = arith.constant 0 : index
    %69 = vector.load %arg2[%c6, %c0_49, %c0_50] : memref<9x8x1xf32, #tpu.memory_space<vmem>>, vector<1x8x1xf32>
    %70 = vector.shape_cast %69 : vector<1x8x1xf32> to vector<8x1xf32>
    %c0_51 = arith.constant 0 : index
    %c0_52 = arith.constant 0 : index
    %c0_53 = arith.constant 0 : index
    %71 = vector.load %arg5[%c0_51, %c0_52, %c0_53] : memref<3x1x256xf32, #tpu.memory_space<vmem>>, vector<1x1x256xf32>
    %72 = vector.shape_cast %71 : vector<1x1x256xf32> to vector<1x256xf32>
    %73 = vector.broadcast %70 : vector<8x1xf32> to vector<8x256xf32>
    %74 = vector.broadcast %72 : vector<1x256xf32> to vector<8x256xf32>
    %75 = arith.mulf %73, %74 : vector<8x256xf32>
    %76 = arith.mulf %68, %75 : vector<8x256xf32>
    %77 = arith.addf %67, %76 : vector<8x256xf32>
    %c0_54 = arith.constant 0 : index
    %c33 = arith.constant 33 : index
    %78 = vector.load %arg10[%c0_54, %c33] : memref<8x290xf32, #tpu.memory_space<vmem>>, vector<8x256xf32>
    %c7 = arith.constant 7 : index
    %c0_55 = arith.constant 0 : index
    %c0_56 = arith.constant 0 : index
    %79 = vector.load %arg2[%c7, %c0_55, %c0_56] : memref<9x8x1xf32, #tpu.memory_space<vmem>>, vector<1x8x1xf32>
    %80 = vector.shape_cast %79 : vector<1x8x1xf32> to vector<8x1xf32>
    %c1_57 = arith.constant 1 : index
    %c0_58 = arith.constant 0 : index
    %c0_59 = arith.constant 0 : index
    %81 = vector.load %arg5[%c1_57, %c0_58, %c0_59] : memref<3x1x256xf32, #tpu.memory_space<vmem>>, vector<1x1x256xf32>
    %82 = vector.shape_cast %81 : vector<1x1x256xf32> to vector<1x256xf32>
    %83 = vector.broadcast %80 : vector<8x1xf32> to vector<8x256xf32>
    %84 = vector.broadcast %82 : vector<1x256xf32> to vector<8x256xf32>
    %85 = arith.mulf %83, %84 : vector<8x256xf32>
    %86 = arith.mulf %78, %85 : vector<8x256xf32>
    %87 = arith.addf %77, %86 : vector<8x256xf32>
    %c0_60 = arith.constant 0 : index
    %c34 = arith.constant 34 : index
    %88 = vector.load %arg10[%c0_60, %c34] : memref<8x290xf32, #tpu.memory_space<vmem>>, vector<8x256xf32>
    %c8 = arith.constant 8 : index
    %c0_61 = arith.constant 0 : index
    %c0_62 = arith.constant 0 : index
    %89 = vector.load %arg2[%c8, %c0_61, %c0_62] : memref<9x8x1xf32, #tpu.memory_space<vmem>>, vector<1x8x1xf32>
    %90 = vector.shape_cast %89 : vector<1x8x1xf32> to vector<8x1xf32>
    %c2_63 = arith.constant 2 : index
    %c0_64 = arith.constant 0 : index
    %c0_65 = arith.constant 0 : index
    %91 = vector.load %arg5[%c2_63, %c0_64, %c0_65] : memref<3x1x256xf32, #tpu.memory_space<vmem>>, vector<1x1x256xf32>
    %92 = vector.shape_cast %91 : vector<1x1x256xf32> to vector<1x256xf32>
    %93 = vector.broadcast %90 : vector<8x1xf32> to vector<8x256xf32>
    %94 = vector.broadcast %92 : vector<1x256xf32> to vector<8x256xf32>
    %95 = arith.mulf %93, %94 : vector<8x256xf32>
    %96 = arith.mulf %88, %95 : vector<8x256xf32>
    %97 = arith.addf %87, %96 : vector<8x256xf32>
    %cst_66 = arith.constant 0.000000e+00 : f32
    %98 = vector.broadcast %cst_66 : f32 to vector<8x256xf32>
    %c0_67 = arith.constant 0 : index
    %c0_68 = arith.constant 0 : index
    %c0_69 = arith.constant 0 : index
    %99 = vector.load %arg3[%c0_67, %c0_68, %c0_69] : memref<8x8x1xf32, #tpu.memory_space<vmem>>, vector<1x8x1xf32>
    %100 = vector.shape_cast %99 : vector<1x8x1xf32> to vector<8x1xf32>
    %101 = vector.extract_strided_slice %97 {offsets = [0, 0], sizes = [1, 256], strides = [1, 1]} : vector<8x256xf32> to vector<1x256xf32>
    %102 = vector.broadcast %100 : vector<8x1xf32> to vector<8x256xf32>
    %103 = vector.broadcast %101 : vector<1x256xf32> to vector<8x256xf32>
    %104 = arith.mulf %102, %103 : vector<8x256xf32>
    %105 = arith.addf %98, %104 : vector<8x256xf32>
    %c1_70 = arith.constant 1 : index
    %c0_71 = arith.constant 0 : index
    %c0_72 = arith.constant 0 : index
    %106 = vector.load %arg3[%c1_70, %c0_71, %c0_72] : memref<8x8x1xf32, #tpu.memory_space<vmem>>, vector<1x8x1xf32>
    %107 = vector.shape_cast %106 : vector<1x8x1xf32> to vector<8x1xf32>
    %108 = vector.extract_strided_slice %97 {offsets = [1, 0], sizes = [1, 256], strides = [1, 1]} : vector<8x256xf32> to vector<1x256xf32>
    %109 = vector.broadcast %107 : vector<8x1xf32> to vector<8x256xf32>
    %110 = vector.broadcast %108 : vector<1x256xf32> to vector<8x256xf32>
    %111 = arith.mulf %109, %110 : vector<8x256xf32>
    %112 = arith.addf %105, %111 : vector<8x256xf32>
    %c2_73 = arith.constant 2 : index
    %c0_74 = arith.constant 0 : index
    %c0_75 = arith.constant 0 : index
    %113 = vector.load %arg3[%c2_73, %c0_74, %c0_75] : memref<8x8x1xf32, #tpu.memory_space<vmem>>, vector<1x8x1xf32>
    %114 = vector.shape_cast %113 : vector<1x8x1xf32> to vector<8x1xf32>
    %115 = vector.extract_strided_slice %97 {offsets = [2, 0], sizes = [1, 256], strides = [1, 1]} : vector<8x256xf32> to vector<1x256xf32>
    %116 = vector.broadcast %114 : vector<8x1xf32> to vector<8x256xf32>
    %117 = vector.broadcast %115 : vector<1x256xf32> to vector<8x256xf32>
    %118 = arith.mulf %116, %117 : vector<8x256xf32>
    %119 = arith.addf %112, %118 : vector<8x256xf32>
    %c3_76 = arith.constant 3 : index
    %c0_77 = arith.constant 0 : index
    %c0_78 = arith.constant 0 : index
    %120 = vector.load %arg3[%c3_76, %c0_77, %c0_78] : memref<8x8x1xf32, #tpu.memory_space<vmem>>, vector<1x8x1xf32>
    %121 = vector.shape_cast %120 : vector<1x8x1xf32> to vector<8x1xf32>
    %122 = vector.extract_strided_slice %97 {offsets = [3, 0], sizes = [1, 256], strides = [1, 1]} : vector<8x256xf32> to vector<1x256xf32>
    %123 = vector.broadcast %121 : vector<8x1xf32> to vector<8x256xf32>
    %124 = vector.broadcast %122 : vector<1x256xf32> to vector<8x256xf32>
    %125 = arith.mulf %123, %124 : vector<8x256xf32>
    %126 = arith.addf %119, %125 : vector<8x256xf32>
    %c4_79 = arith.constant 4 : index
    %c0_80 = arith.constant 0 : index
    %c0_81 = arith.constant 0 : index
    %127 = vector.load %arg3[%c4_79, %c0_80, %c0_81] : memref<8x8x1xf32, #tpu.memory_space<vmem>>, vector<1x8x1xf32>
    %128 = vector.shape_cast %127 : vector<1x8x1xf32> to vector<8x1xf32>
    %129 = vector.extract_strided_slice %97 {offsets = [4, 0], sizes = [1, 256], strides = [1, 1]} : vector<8x256xf32> to vector<1x256xf32>
    %130 = vector.broadcast %128 : vector<8x1xf32> to vector<8x256xf32>
    %131 = vector.broadcast %129 : vector<1x256xf32> to vector<8x256xf32>
    %132 = arith.mulf %130, %131 : vector<8x256xf32>
    %133 = arith.addf %126, %132 : vector<8x256xf32>
    %c5_82 = arith.constant 5 : index
    %c0_83 = arith.constant 0 : index
    %c0_84 = arith.constant 0 : index
    %134 = vector.load %arg3[%c5_82, %c0_83, %c0_84] : memref<8x8x1xf32, #tpu.memory_space<vmem>>, vector<1x8x1xf32>
    %135 = vector.shape_cast %134 : vector<1x8x1xf32> to vector<8x1xf32>
    %136 = vector.extract_strided_slice %97 {offsets = [5, 0], sizes = [1, 256], strides = [1, 1]} : vector<8x256xf32> to vector<1x256xf32>
    %137 = vector.broadcast %135 : vector<8x1xf32> to vector<8x256xf32>
    %138 = vector.broadcast %136 : vector<1x256xf32> to vector<8x256xf32>
    %139 = arith.mulf %137, %138 : vector<8x256xf32>
    %140 = arith.addf %133, %139 : vector<8x256xf32>
    %c6_85 = arith.constant 6 : index
    %c0_86 = arith.constant 0 : index
    %c0_87 = arith.constant 0 : index
    %141 = vector.load %arg3[%c6_85, %c0_86, %c0_87] : memref<8x8x1xf32, #tpu.memory_space<vmem>>, vector<1x8x1xf32>
    %142 = vector.shape_cast %141 : vector<1x8x1xf32> to vector<8x1xf32>
    %143 = vector.extract_strided_slice %97 {offsets = [6, 0], sizes = [1, 256], strides = [1, 1]} : vector<8x256xf32> to vector<1x256xf32>
    %144 = vector.broadcast %142 : vector<8x1xf32> to vector<8x256xf32>
    %145 = vector.broadcast %143 : vector<1x256xf32> to vector<8x256xf32>
    %146 = arith.mulf %144, %145 : vector<8x256xf32>
    %147 = arith.addf %140, %146 : vector<8x256xf32>
    %c7_88 = arith.constant 7 : index
    %c0_89 = arith.constant 0 : index
    %c0_90 = arith.constant 0 : index
    %148 = vector.load %arg3[%c7_88, %c0_89, %c0_90] : memref<8x8x1xf32, #tpu.memory_space<vmem>>, vector<1x8x1xf32>
    %149 = vector.shape_cast %148 : vector<1x8x1xf32> to vector<8x1xf32>
    %150 = vector.extract_strided_slice %97 {offsets = [7, 0], sizes = [1, 256], strides = [1, 1]} : vector<8x256xf32> to vector<1x256xf32>
    %151 = vector.broadcast %149 : vector<8x1xf32> to vector<8x256xf32>
    %152 = vector.broadcast %150 : vector<1x256xf32> to vector<8x256xf32>
    %153 = arith.mulf %151, %152 : vector<8x256xf32>
    %154 = arith.addf %147, %153 : vector<8x256xf32>
    %c0_91 = arith.constant 0 : index
    %c0_92 = arith.constant 0 : index
    %155 = vector.load %arg4[%c0_91, %c0_92] : memref<8x1xf32, #tpu.memory_space<vmem>>, vector<8x1xf32>
    %156 = vector.broadcast %155 : vector<8x1xf32> to vector<8x256xf32>
    %157 = arith.addf %154, %156 : vector<8x256xf32>
    %c0_93 = arith.constant 0 : index
    %c0_94 = arith.constant 0 : index
    %c0_95 = arith.constant 0 : index
    %158 = vector.load %arg6[%c0_93, %c0_94, %c0_95] : memref<1x4x256xf32, #tpu.memory_space<vmem>>, vector<1x4x256xf32>
    %159 = vector.shape_cast %158 : vector<1x4x256xf32> to vector<4x256xf32>
    %cst_96 = arith.constant 0.000000e+00 : f32
    %160 = vector.broadcast %cst_96 : f32 to vector<4x256xf32>
    %161 = arith.maximumf %159, %160 : vector<4x256xf32>
    %c0_97 = arith.constant 0 : index
    %c0_98 = arith.constant 0 : index
    %c0_99 = arith.constant 0 : index
    %162 = vector.load %arg7[%c0_97, %c0_98, %c0_99] : memref<4x8x1xf32, #tpu.memory_space<vmem>>, vector<1x8x1xf32>
    %163 = vector.shape_cast %162 : vector<1x8x1xf32> to vector<8x1xf32>
    %164 = vector.extract_strided_slice %161 {offsets = [0, 0], sizes = [1, 256], strides = [1, 1]} : vector<4x256xf32> to vector<1x256xf32>
    %165 = vector.broadcast %163 : vector<8x1xf32> to vector<8x256xf32>
    %166 = vector.broadcast %164 : vector<1x256xf32> to vector<8x256xf32>
    %167 = arith.mulf %165, %166 : vector<8x256xf32>
    %168 = arith.addf %157, %167 : vector<8x256xf32>
    %c1_100 = arith.constant 1 : index
    %c0_101 = arith.constant 0 : index
    %c0_102 = arith.constant 0 : index
    %169 = vector.load %arg7[%c1_100, %c0_101, %c0_102] : memref<4x8x1xf32, #tpu.memory_space<vmem>>, vector<1x8x1xf32>
    %170 = vector.shape_cast %169 : vector<1x8x1xf32> to vector<8x1xf32>
    %171 = vector.extract_strided_slice %161 {offsets = [1, 0], sizes = [1, 256], strides = [1, 1]} : vector<4x256xf32> to vector<1x256xf32>
    %172 = vector.broadcast %170 : vector<8x1xf32> to vector<8x256xf32>
    %173 = vector.broadcast %171 : vector<1x256xf32> to vector<8x256xf32>
    %174 = arith.mulf %172, %173 : vector<8x256xf32>
    %175 = arith.addf %168, %174 : vector<8x256xf32>
    %c2_103 = arith.constant 2 : index
    %c0_104 = arith.constant 0 : index
    %c0_105 = arith.constant 0 : index
    %176 = vector.load %arg7[%c2_103, %c0_104, %c0_105] : memref<4x8x1xf32, #tpu.memory_space<vmem>>, vector<1x8x1xf32>
    %177 = vector.shape_cast %176 : vector<1x8x1xf32> to vector<8x1xf32>
    %178 = vector.extract_strided_slice %161 {offsets = [2, 0], sizes = [1, 256], strides = [1, 1]} : vector<4x256xf32> to vector<1x256xf32>
    %179 = vector.broadcast %177 : vector<8x1xf32> to vector<8x256xf32>
    %180 = vector.broadcast %178 : vector<1x256xf32> to vector<8x256xf32>
    %181 = arith.mulf %179, %180 : vector<8x256xf32>
    %182 = arith.addf %175, %181 : vector<8x256xf32>
    %c3_106 = arith.constant 3 : index
    %c0_107 = arith.constant 0 : index
    %c0_108 = arith.constant 0 : index
    %183 = vector.load %arg7[%c3_106, %c0_107, %c0_108] : memref<4x8x1xf32, #tpu.memory_space<vmem>>, vector<1x8x1xf32>
    %184 = vector.shape_cast %183 : vector<1x8x1xf32> to vector<8x1xf32>
    %185 = vector.extract_strided_slice %161 {offsets = [3, 0], sizes = [1, 256], strides = [1, 1]} : vector<4x256xf32> to vector<1x256xf32>
    %186 = vector.broadcast %184 : vector<8x1xf32> to vector<8x256xf32>
    %187 = vector.broadcast %185 : vector<1x256xf32> to vector<8x256xf32>
    %188 = arith.mulf %186, %187 : vector<8x256xf32>
    %189 = arith.addf %182, %188 : vector<8x256xf32>
    %c0_109 = arith.constant 0 : index
    %c0_110 = arith.constant 0 : index
    %190 = vector.load %arg8[%c0_109, %c0_110] : memref<8x1xf32, #tpu.memory_space<vmem>>, vector<8x1xf32>
    %191 = vector.broadcast %190 : vector<8x1xf32> to vector<8x256xf32>
    %192 = arith.addf %189, %191 : vector<8x256xf32>
    %c0_111 = arith.constant 0 : index
    %c0_112 = arith.constant 0 : index
    %c0_113 = arith.constant 0 : index
    %193 = vector.load %arg9[%c0_111, %c0_112, %c0_113] : memref<1x8x256xf32, #tpu.memory_space<vmem>>, vector<1x8x256xf32>
    %194 = vector.shape_cast %193 : vector<1x8x256xf32> to vector<8x256xf32>
    %195 = vector.shape_cast %192 : vector<8x256xf32> to vector<1x8x256xf32>
    tpu.vector_store %arg9[%c0_111, %c0_112, %c0_113], %195 {strides = array<i32>} : memref<1x8x256xf32, #tpu.memory_space<vmem>>, vector<1x8x256xf32>,
    return
  }
  func.func @transform_0(%arg0: i32) -> (i32, i32, i32) {
    %c0_i32 = arith.constant 0 : i32
    %c0_i32_0 = arith.constant 0 : i32
    %c0_i32_1 = arith.constant 0 : i32
    return %arg0, %c0_i32, %c0_i32_0 : i32, i32, i32
  }
  func.func @transform_1(%arg0: i32) -> (i32, i32, i32) {
    %c0_i32 = arith.constant 0 : i32
    %c0_i32_0 = arith.constant 0 : i32
    %c0_i32_1 = arith.constant 0 : i32
    %c0_i32_2 = arith.constant 0 : i32
    return %c0_i32, %c0_i32_0, %c0_i32_1 : i32, i32, i32
  }
  func.func @transform_2(%arg0: i32) -> (i32, i32, i32) {
    %c0_i32 = arith.constant 0 : i32
    %c0_i32_0 = arith.constant 0 : i32
    %c0_i32_1 = arith.constant 0 : i32
    %c0_i32_2 = arith.constant 0 : i32
    return %c0_i32, %c0_i32_0, %c0_i32_1 : i32, i32, i32
  }
  func.func @transform_3(%arg0: i32) -> (i32, i32) {
    %c0_i32 = arith.constant 0 : i32
    %c0_i32_0 = arith.constant 0 : i32
    %c0_i32_1 = arith.constant 0 : i32
    return %c0_i32, %c0_i32_0 : i32, i32
  }
  func.func @transform_4(%arg0: i32) -> (i32, i32, i32) {
    %c0_i32 = arith.constant 0 : i32
    %c0_i32_0 = arith.constant 0 : i32
    %c0_i32_1 = arith.constant 0 : i32
    %c0_i32_2 = arith.constant 0 : i32
    return %c0_i32, %c0_i32_0, %c0_i32_1 : i32, i32, i32
  }
  func.func @transform_5(%arg0: i32) -> (i32, i32, i32) {
    %c0_i32 = arith.constant 0 : i32
    %c0_i32_0 = arith.constant 0 : i32
    %c0_i32_1 = arith.constant 0 : i32
    return %arg0, %c0_i32, %c0_i32_0 : i32, i32, i32
  }
  func.func @transform_6(%arg0: i32) -> (i32, i32, i32) {
    %c0_i32 = arith.constant 0 : i32
    %c0_i32_0 = arith.constant 0 : i32
    %c0_i32_1 = arith.constant 0 : i32
    %c0_i32_2 = arith.constant 0 : i32
    return %c0_i32, %c0_i32_0, %c0_i32_1 : i32, i32, i32
  }
  func.func @transform_7(%arg0: i32) -> (i32, i32) {
    %c0_i32 = arith.constant 0 : i32
    %c0_i32_0 = arith.constant 0 : i32
    %c0_i32_1 = arith.constant 0 : i32
    return %c0_i32, %c0_i32_0 : i32, i32
  }
  func.func @transform_8(%arg0: i32) -> (i32, i32, i32) {
    %c0_i32 = arith.constant 0 : i32
    %c0_i32_0 = arith.constant 0 : i32
    %c0_i32_1 = arith.constant 0 : i32
    return %arg0, %c0_i32, %c0_i32_0 : i32, i32, i32
  }
}

</mosaic_0001>

<bundles_post_ra>
// kernel: squeeze.9
= control target key start
LH: loop header
LB: loop body
LE: loop exit
PB: predicated region body
PF: predicated region fallthrough
CT: control target
= control target key end

     0   :  { %vm16_vm0 = vcmask 64512   ;;  %s61_s0 = inlined_call_operand.vmem [shape: f32[8,3,3], index: 0, kind: input, shape index: {}]   ;;  %s62_s1 = inlined_call_operand.vmem [shape: f32[8,9], index: 1, kind: output, shape index: {}]  }
   0x1   :  { %v29_v0 = vld [vmem:[%s61_s0 + $0x8] sm:$0xf]  ;;  %v30_v1 = vld [vmem:[%s61_s0 + $0x4] sm:$0xf]  ;;  %v13_v2 = vld [vmem:[%s61_s0] sm:$0xf] }
   0x2   :  { %8 = vst [vmem:[#allocation0 + $0x10] sm:$0xf] %v29_v0  ;;  %12 = vst [vmem:[#allocation0 + $0x8] sm:$0xf] %v30_v1 }
   0x3   :  { %14 = vst [vmem:[#allocation0] sm:$0xf] %v13_v2 }
   0x9   :  { %v19_v4 = vld [vmem:[#allocation0 + $0x8] sm:$0x7]   ;;  %v24_v5 = vld [vmem:[#allocation0 + $0x10] sm:$0x7]  }
   0xa   :  { %v15_v3 = vld [vmem:[#allocation0] sm:$0x7]   ;;  %31 = vst.msk [vmem:[%s62_s1 + $0x3] sm:$0x7] %vm16_vm0, %v19_v4   ;;  %32 = vst.msk [vmem:[%s62_s1 + $0x6] sm:$0x7] %vm16_vm0, %v24_v5  }
   0xb   :  { %17 = vst.msk [vmem:[%s62_s1] sm:$0x7] %vm16_vm0, %v15_v3  }

// kernel: block1_forward.2
= control target key start
LH: loop header
LB: loop body
LE: loop exit
PB: predicated region body
PF: predicated region fallthrough
CT: control target
= control target key end

     0   :  { %s876_s18 = smov 0   ;;  %s1007_s0 = inlined_call_operand.vmem [shape: f32[2,4,256], index: 0, kind: input, shape index: {}]   ;;  %s1008_s1 = inlined_call_operand.vmem [shape: f32[9,4,1], index: 1, kind: input, shape index: {}]   ;;  %s1009_s2 = inlined_call_operand.vmem [shape: f32[4,8,1], index: 2, kind: input, shape index: {}]   ;;  %s1010_s3 = inlined_call_operand.vmem [shape: f32[8,1], index: 3, kind: input, shape index: {}]   ;;  %s1011_s4 = inlined_call_operand.vmem [shape: f32[3,1,256], index: 4, kind: input, shape index: {}]   ;;  %s1012_s5 = inlined_call_operand.vmem [shape: f32[2,8,256], index: 5, kind: output, shape index: {}]  }
   0x1 LB: > { %s766_s19 = sadd.s32 4294967295, %s826_s18   ;;  %p770_p0 = scmp.ge.s32.totalorder %s826_s18, 1  ;;  %s826_s18 = sphi %s876_s18, %s15_s18  }
   0x2   : > { %p187_p1 = scmp.lt.s32.totalorder %s826_s18, 3 }
   0x4   : > { %p188_p2 = pnand %p770_p0, %p187_p1 }
   0x5   : > { %v779_v0 = vld [vmem:[%s1008_s1 + $0xc] sm:$0xf] (!%p188_p2)  ;;  %v775_v1 = vld [vmem:[%s1008_s1 + $0x4] sm:$0xf] (!%p188_p2)  ;;  %p215_p3 = scmp.lt.s32.totalorder (!%p188_p2), %s766_s19, 1  ;;  %v828_v2 = vmov (!%p188_p2), 0   ;;  %v253_v12 = vlaneseq (!%p188_p2) }
   0x6   : > { %191 = sbr.rel (%p188_p2) target bundleno = 432 (0x1b0), region = 40  ;;  %819 = vset.pattern.permute.xlu1 (!%p188_p2), %v828_v2  ;;  %818 = vset.pattern.permute.xlu0 (!%p188_p2), %v828_v2  ;;  %v780_v3 = vld [vmem:[%s1008_s1 + $0x10] sm:$0xf] (!%p188_p2)  ;;  %v777_v4 = vld [vmem:[%s1008_s1 + $0x8] sm:$0xf] (!%p188_p2)  ;;  %s829_s15 = smov (!%p188_p2), 17  }
   0x7   : > { %376 = vperm.xlu1 (!%p188_p2), %819, %v779_v0   ;;  %279 = vperm.xlu0 (!%p188_p2), %818, %v775_v1   ;;  %v782_v5 = vld [vmem:[%s1008_s1 + $0x18] sm:$0xf] (!%p188_p2)  ;;  %v781_v6 = vld [vmem:[%s1008_s1 + $0x14] sm:$0xf] (!%p188_p2)  ;;  %v784_v7 = vld [vmem:[%s1008_s1 + $0x20] sm:$0xf] (!%p188_p2) }
   0x8   : > { %v783_v8 = vld [vmem:[%s1008_s1 + $0x1c] sm:$0xf] (!%p188_p2)  ;;  %vm228_vm0 = vcmask (!%p188_p2), 273408   ;;  %v830_v11 = vmov (!%p188_p2), 0.0   ;;  %v915_v13 = vshrl.u32 (!%p188_p2), %v253_v12, 7  ;;  %s831_s24 = smov (!%p188_p2), 1  }
   0x9   : > { %227 = vst [vmem:[#allocation2] sm:$0xff] (!%p188_p2), %v830_v11  ;;  %229 = vst.msk [vmem:[#allocation2 + $0x8] sm:$0xf] (!%p188_p2), %vm228_vm0, %v830_v11  ;;  %v246_v16 = vld [vmem:[%s1011_s4] sm:$0x3] (!%p188_p2)  ;;  %s832_s25 = smov (!%p188_p2), 16  }
   0xa   : > { %v918_v14 = vsub.s32 (!%p188_p2), 0, %v915_v13  ;;  %v921_v15 = vsub.s32 (!%p188_p2), 1, %v915_v13  ;;  %v776_v17 = vld [vmem:[%s1011_s4 + $0x2] sm:$0x3] (!%p188_p2)  ;;  %v778_v22 = vld [vmem:[%s1011_s4 + $0x4] sm:$0x3] (!%p188_p2) }
   0xb   : > { %412 = vperm.xlu1 (!%p188_p2), %819, %v780_v3   ;;  %329 = vperm.xlu0 (!%p188_p2), %818, %v777_v4   ;;  %s833_s26 = smov (!%p188_p2), 2   ;;  %s834_s27 = smov (!%p188_p2), 18   ;;  %vm238_vm1 = vcmask (!%p188_p2), 1043592   ;;  %vm239_vm2 = vcmask (!%p188_p2), 1047556   ;;  %vm234_vm3 = vcmask (!%p188_p2), 138240   ;;  %vm242_vm4 = vcmask (!%p188_p2), 134144  }
   0xc   : > { %v930_v18 = vrot.slane (!%p188_p2), %v246_v16, %v918_v14  ;;  %v933_v19 = vrot.slane (!%p188_p2), %v246_v16, %v921_v15  ;;  %v286_v20 = vrot.slane (!%p188_p2), %v776_v17, %v918_v14  ;;  %v290_v21 = vrot.slane (!%p188_p2), %v776_v17, %v921_v15  ;;  %vm240_vm5 = vmor (!%p188_p2), %vm239_vm2, %vm238_vm1  ;;  %s836_s29 = smov (!%p188_p2), 32   ;;  %v245_v58 = vld [vmem:[%s1008_s1] sm:$0xf] (!%p188_p2)  ;;  %s837_s7 = smov (!%p188_p2), 34  }
   0xd   : > { %s1014_s19 = smov (!%p215_p3, %s766_s19), 1  ;;  %v336_v25 = vrot.slane %v778_v22, %v918_v14  ;;  %v340_v26 = vrot.slane %v778_v22, %v921_v15  ;;  %vm301_vm6 = vcmask 7168   ;;  %vm351_vm7 = vcmask 15360   ;;  %s838_s8 = smov 127  }
   0xe   : > { %s790_s28 = sshll.u32 %s1014_s19, 3  ;;  %vm387_vm8 = vcmask 130048   ;;  %s839_s9 = smov 126   ;;  %vm458_vm9 = vcmask 146432   ;;  %vm494_vm10 = vcmask 261120   ;;  %vm530_vm11 = vcmask 269312  }
   0xf   : > { %s219_s10 = scalar_lea.vmem %s1007_s0, %s790_s28  ;;  %483 = vperm.xlu1 %819, %v782_v5   ;;  %447 = vperm.xlu0 %818, %v781_v6   ;;  %s835_s28 = smov 33   ;;  %vm566_vm12 = vcmask 277504   ;;  %vm315_vm13 = vcmask 1043456   ;;  %vm317_vm14 = vcmask 1039360   ;;  %vm366_vm15 = vcmask 1031168  }
  0x10   : > { %v225_v9 = vld [vmem:[%s219_s10] sm:$0xff]  ;;  %s840_s10 = smov 112   ;;  %s841_s11 = smov 111   ;;  %vm402_vm0 = vcmask 916480   ;;  %vm437_vm1 = vcmask 908288   ;;  %vm473_vm2 = vcmask 900096  }
  0x11   : > { %v226_v10 = vmax.f32 %v225_v9, 0.0  ;;  %s842_s12 = smov 110   ;;  %s843_s13 = smov 96  }
  0x12   : > { %s844_s14 = smov 95  }
  0x13   : > { %555 = vperm.xlu1 %819, %v784_v7   ;;  %519 = vperm.xlu0 %818, %v783_v8  }
  0x17   : > { %231 = vrot.lane.b32.xlu0 %v226_v10, %s829_s15 }
  0x86   : > { %v377_v23 = vpop.permute.xlu1 %376  ;;  %v280_v24 = vpop.permute.xlu0 %279 }
  0x87   : > { %v379_v27 = vmul.f32 %v377_v23, %v930_v18  ;;  %v380_v28 = vmul.f32 %v377_v23, %v933_v19  ;;  %v293_v29 = vmul.f32 %v286_v20, %v280_v24  ;;  %v294_v30 = vmul.f32 %v290_v21, %v280_v24 }
  0x89   : > { %v297_v31 = vcombine.low %v293_v29, %v294_v30  ;;  %v383_v34 = vcombine.low %v379_v27, %v380_v28 }
  0x8a   : > { %v413_v32 = vpop.permute.xlu1 %412  ;;  %v330_v33 = vpop.permute.xlu0 %329 }
  0x8b   : > { %v343_v35 = vmul.f32 %v336_v25, %v330_v33  ;;  %v344_v36 = vmul.f32 %v340_v26, %v330_v33  ;;  %298 = vrot.lane.b32.xlu1 %v297_v31, %s831_s24  ;;  %v415_v37 = vmul.f32 %v413_v32, %v286_v20  ;;  %v416_v38 = vmul.f32 %v413_v32, %v290_v21 }
  0x8d   : > { %v347_v39 = vcombine.low %v343_v35, %v344_v36  ;;  %v419_v44 = vcombine.low %v415_v37, %v416_v38 }
  0x8e   : > { %v484_v40 = vpop.permute.xlu1 %483  ;;  %v448_v41 = vpop.permute.xlu0 %447 }
  0x8f   : > { %v450_v42 = vmul.f32 %v448_v41, %v336_v25  ;;  %v451_v43 = vmul.f32 %v448_v41, %v340_v26  ;;  %384 = vrot.lane.b32.xlu1 %v383_v34, %s832_s25  ;;  %348 = vrot.lane.b32.xlu0 %v347_v39, %s833_s26  ;;  %v486_v46 = vmul.f32 %v484_v40, %v930_v18 }
  0x90   : > { %v487_v47 = vmul.f32 %v484_v40, %v933_v19 }
  0x91   : > { %v454_v45 = vcombine.low %v450_v42, %v451_v43 }
  0x92   : > { %v520_v48 = vpop.permute.xlu0 %519  ;;  %v556_v49 = vpop.permute.xlu1 %555  ;;  %v490_v53 = vcombine.low %v486_v46, %v487_v47 }
  0x93   : > { %v522_v50 = vmul.f32 %v520_v48, %v286_v20  ;;  %v523_v51 = vmul.f32 %v520_v48, %v290_v21  ;;  %455 = vrot.lane.b32.xlu1 %v454_v45, %s834_s27  ;;  %420 = vrot.lane.b32.xlu0 %v419_v44, %s829_s15  ;;  %v558_v54 = vmul.f32 %v556_v49, %v336_v25  ;;  %s845_s15 = smov 94  }
  0x94   : > { %v559_v55 = vmul.f32 %v556_v49, %v340_v26 }
  0x95   : > { %v526_v52 = vcombine.low %v522_v50, %v523_v51  ;;  %v785_v51 = vld [vmem:[%s1009_s2 + $0x8] sm:$0xff] }
  0x96   : > { %v232_v56 = vpop.permute.xlu0 %231  ;;  %v562_v60 = vcombine.low %v558_v54, %v559_v55  ;;  %v786_v54 = vld [vmem:[%s1009_s2 + $0x10] sm:$0xff]  ;;  %v701_v55 = vld [vmem:[%s1010_s3] sm:$0xff] }
  0x97   : > { %527 = vrot.lane.b32.xlu1 %v526_v52, %s835_s28  ;;  %v233_v57 = vrot.slane %v232_v56, 4  ;;  %491 = vrot.lane.b32.xlu0 %v490_v53, %s836_s29  ;;  %v585_v52 = vld [vmem:[%s1009_s2] sm:$0xff]  ;;  %v787_v53 = vld [vmem:[%s1009_s2 + $0x18] sm:$0xff]  ;;  %s791_s28 = sshll.u32 %s1014_s19, 4 }
  0x98   : > { %s224_s6 = scalar_lea.vmem %s1012_s5, %s791_s28 }
  0x99   : > { %v235_v59 = vsel %vm234_vm3, %v233_v57, %v232_v56  ;;  %243 = vst.msk [vmem:[#allocation2 + $0x8] sm:$0xf] %vm242_vm4, %v233_v57  ;;  %vm545_vm4 = vcmask 777216  }
  0x9a   : > { %241 = vst.msk [vmem:[#allocation2] sm:$0xff] %vm240_vm5, %v235_v59  ;;  %vm581_vm5 = vcmask 769024  }
  0x9b   : > { %249 = vperm.xlu1 %819, %v245_v58   ;;  %563 = vrot.lane.b32.xlu0 %v562_v60, %s837_s7 }
  0xa0   : > { %v272_v62 = vld [vmem:[#allocation2 + $0x8] sm:$0xf] }
  0xa1   : > { %v951_v0 = vld [vmem:[#allocation2] sm:$0xff]  ;;  %v322_v8 = vld [vmem:[#allocation2 + $0x8] sm:$0xf] }
  0xa2   : > { %v371_v20 = vld [vmem:[#allocation2 + $0x8] sm:$0xf] }
  0xa3   : > { %v407_v26 = vld [vmem:[#allocation2 + $0x8] sm:$0xf] }
  0xa4   : > { %v442_v32 = vld [vmem:[#allocation2 + $0x8] sm:$0xf] }
  0xa5   : > { %v478_v38 = vld [vmem:[#allocation2 + $0x8] sm:$0xf] }
  0xa6   : > { %v514_v44 = vld [vmem:[#allocation2 + $0x8] sm:$0xf] }
  0xa7   : > { %v550_v48 = vld [vmem:[#allocation2 + $0x8] sm:$0xf] }
  0xfd   : > { %v299_v61 = vpop.permute.xlu1 %298 }
  0xfe   : > { %v300_v63 = vrot.slane %v299_v61, 4 }
 0x100   : > { %v302_v1 = vsel %vm301_vm6, %v300_v63, %v299_v61  ;;  %v306_v2 = vmul.f32 %v300_v63, %v272_v62 }
 0x101   : > { %v305_v3 = vmul.f32 %v302_v1, %v951_v0  ;;  %v385_v4 = vpop.permute.xlu1 %384  ;;  %v349_v5 = vpop.permute.xlu0 %348 }
 0x102   : > { %311 = vrot.lane.b32.xlu1 %v306_v2, %s838_s8  ;;  %v386_v6 = vrot.slane %v385_v4, 4  ;;  %v350_v7 = vrot.slane %v349_v5, 4 }
 0x103   : > { %309 = vrot.lane.b32.xlu0 %v305_v3, %s838_s8 }
 0x104   : > { %v352_v9 = vsel %vm351_vm7, %v350_v7, %v349_v5  ;;  %v356_v10 = vmul.f32 %v350_v7, %v322_v8  ;;  %v388_v16 = vsel %vm387_vm8, %v386_v6, %v385_v4  ;;  %v392_v22 = vmul.f32 %v386_v6, %v371_v20 }
 0x105   : > { %v355_v11 = vmul.f32 %v352_v9, %v951_v0  ;;  %v421_v12 = vpop.permute.xlu0 %420  ;;  %v456_v21 = vpop.permute.xlu1 %455  ;;  %v391_v23 = vmul.f32 %v388_v16, %v951_v0 }
 0x106   : > { %v422_v17 = vrot.slane %v421_v12, 4  ;;  %361 = vrot.lane.b32.xlu1 %v356_v10, %s839_s9  ;;  %v457_v24 = vrot.slane %v456_v21, 4 }
 0x107   : > { %359 = vrot.lane.b32.xlu0 %v355_v11, %s839_s9 }
 0x108   : > { %v423_v25 = vsel %vm234_vm3, %v422_v17, %v421_v12  ;;  %v427_v28 = vmul.f32 %v422_v17, %v407_v26  ;;  %v459_v30 = vsel %vm458_vm9, %v457_v24, %v456_v21  ;;  %v463_v34 = vmul.f32 %v457_v24, %v442_v32 }
 0x109   : > { %v492_v27 = vpop.permute.xlu0 %491  ;;  %v426_v29 = vmul.f32 %v423_v25, %v951_v0  ;;  %v528_v33 = vpop.permute.xlu1 %527  ;;  %v462_v35 = vmul.f32 %v459_v30, %v951_v0  ;;  %vm509_vm3 = vcmask 785408  }
 0x10a   : > { %397 = vrot.lane.b32.xlu1 %v392_v22, %s840_s10  ;;  %v493_v31 = vrot.slane %v492_v27, 4  ;;  %v529_v36 = vrot.slane %v528_v33, 4 }
 0x10b   : > { %395 = vrot.lane.b32.xlu0 %v391_v23, %s840_s10 }
 0x10c   : > { %v495_v37 = vsel %vm494_vm10, %v493_v31, %v492_v27  ;;  %v499_v40 = vmul.f32 %v493_v31, %v478_v38  ;;  %v531_v42 = vsel %vm530_vm11, %v529_v36, %v528_v33  ;;  %v535_v45 = vmul.f32 %v529_v36, %v514_v44 }
 0x10d   : > { %v564_v39 = vpop.permute.xlu0 %563  ;;  %v498_v41 = vmul.f32 %v495_v37, %v951_v0  ;;  %v534_v46 = vmul.f32 %v531_v42, %v951_v0 }
 0x10e   : > { %432 = vrot.lane.b32.xlu1 %v427_v28, %s841_s11  ;;  %v565_v43 = vrot.slane %v564_v39, 4 }
 0x10f   : > { %430 = vrot.lane.b32.xlu0 %v426_v29, %s841_s11 }
 0x110   : > { %v567_v47 = vsel %vm566_vm12, %v565_v43, %v564_v39  ;;  %v571_v49 = vmul.f32 %v565_v43, %v550_v48 }
 0x111   : > { %v570_v50 = vmul.f32 %v567_v47, %v951_v0 }
 0x112   : > { %468 = vrot.lane.b32.xlu1 %v463_v34, %s842_s12 }
 0x113   : > { %466 = vrot.lane.b32.xlu0 %v462_v35, %s842_s12 }
 0x116   : > { %504 = vrot.lane.b32.xlu1 %v499_v40, %s843_s13 }
 0x117   : > { %502 = vrot.lane.b32.xlu0 %v498_v41, %s843_s13 }
 0x11a   : > { %540 = vrot.lane.b32.xlu1 %v535_v45, %s844_s14  ;;  %v250_v56 = vpop.permute.xlu1 %249 }
 0x11b   : > { %538 = vrot.lane.b32.xlu0 %v534_v46, %s844_s14  ;;  %v263_v1 = vmul.f32 %v930_v18, %v250_v56  ;;  %v264_v2 = vmul.f32 %v933_v19, %v250_v56  ;;  %v627_v56 = vsub.s32 5, %v915_v13 }
 0x11d   : > { %v267_v9 = vcombine.low %v263_v1, %v264_v2  ;;  %v681_v1 = vsub.s32 3, %v915_v13  ;;  %v685_v2 = vsub.s32 7, %v915_v13 }
 0x11e   : > { %576 = vrot.lane.b32.xlu1 %v571_v49, %s845_s15 }
 0x11f   : > { %574 = vrot.lane.b32.xlu0 %v570_v50, %s845_s15  ;;  %v269_v22 = vmul.f32 %v951_v0, %v267_v9 }
 0x122   : > { %618 = vperm.xlu1 %819, %v785_v51  }
 0x123   : > { %588 = vperm.xlu0 %818, %v585_v52  }
 0x126   : > { %676 = vperm.xlu1 %819, %v787_v53  }
 0x127   : > { %647 = vperm.xlu0 %818, %v786_v54  }
 0x12b   : > { %704 = vperm.xlu0 %818, %v701_v55  }
 0x174   : > { %v312_v57 = vpop.permute.xlu1 %311 }
 0x175   : > { %v310_v58 = vpop.permute.xlu0 %309  ;;  %v314_v3 = vrot.slane %v312_v57, 4  ;;  %v598_v57 = vsub.s32 4, %v915_v13 }
 0x176   : > { %v313_v4 = vrot.slane %v310_v58, 4 }
 0x178   : > { %v362_v59 = vpop.permute.xlu1 %361  ;;  %v316_v10 = vsel %vm315_vm13, %v313_v4, %v314_v3 }
 0x179   : > { %v360_v60 = vpop.permute.xlu0 %359  ;;  %v364_v6 = vrot.slane %v362_v59, 4  ;;  %v318_v19 = vsel %vm317_vm14, %v310_v58, %v316_v10  ;;  %v652_v58 = vsub.s32 2, %v915_v13  ;;  %v656_v59 = vsub.s32 6, %v915_v13 }
 0x17a   : > { %v363_v7 = vrot.slane %v360_v60, 4  ;;  %v320_v28 = vadd.f32 %v318_v19, %v269_v22 }
 0x17c   : > { %v398_v61 = vpop.permute.xlu1 %397  ;;  %v365_v17 = vsel %vm315_vm13, %v363_v7, %v364_v6 }
 0x17d   : > { %v396_v62 = vpop.permute.xlu0 %395  ;;  %v400_v11 = vrot.slane %v398_v61, 4  ;;  %v367_v27 = vsel %vm366_vm15, %v360_v60, %v365_v17 }
 0x17e   : > { %v399_v12 = vrot.slane %v396_v62, 4  ;;  %v369_v34 = vadd.f32 %v367_v27, %v320_v28 }
 0x180   : > { %v433_v63 = vpop.permute.xlu1 %432  ;;  %v401_v23 = vsel %vm315_vm13, %v399_v12, %v400_v11 }
 0x181   : > { %v431_v5 = vpop.permute.xlu0 %430  ;;  %v435_v18 = vrot.slane %v433_v63, 4  ;;  %v403_v32 = vsel %vm402_vm0, %v396_v62, %v401_v23 }
 0x182   : > { %v434_v20 = vrot.slane %v431_v5, 4  ;;  %v405_v39 = vadd.f32 %v403_v32, %v369_v34 }
 0x184   : > { %v469_v8 = vpop.permute.xlu1 %468  ;;  %v436_v29 = vsel %vm315_vm13, %v434_v20, %v435_v18 }
 0x185   : > { %v467_v16 = vpop.permute.xlu0 %466  ;;  %v471_v24 = vrot.slane %v469_v8, 4  ;;  %v438_v37 = vsel %vm437_vm1, %v431_v5, %v436_v29 }
 0x186   : > { %v470_v25 = vrot.slane %v467_v16, 4  ;;  %v440_v43 = vadd.f32 %v438_v37, %v405_v39 }
 0x188   : > { %v505_v21 = vpop.permute.xlu1 %504  ;;  %v472_v35 = vsel %vm315_vm13, %v470_v25, %v471_v24 }
 0x189   : > { %v503_v26 = vpop.permute.xlu0 %502  ;;  %v507_v30 = vrot.slane %v505_v21, 4  ;;  %v474_v41 = vsel %vm473_vm2, %v467_v16, %v472_v35 }
 0x18a   : > { %v506_v31 = vrot.slane %v503_v26, 4  ;;  %v476_v49 = vadd.f32 %v474_v41, %v440_v43 }
 0x18c   : > { %v541_v33 = vpop.permute.xlu1 %540  ;;  %v508_v40 = vsel %vm315_vm13, %v506_v31, %v507_v30 }
 0x18d   : > { %v543_v36 = vrot.slane %v541_v33, 4  ;;  %v539_v0 = vpop.permute.xlu0 %538  ;;  %v510_v47 = vsel %vm509_vm3, %v503_v26, %v508_v40 }
 0x18e   : > { %v542_v38 = vrot.slane %v539_v0, 4  ;;  %v512_v52 = vadd.f32 %v510_v47, %v476_v49 }
 0x190   : > { %v577_v42 = vpop.permute.xlu1 %576  ;;  %v544_v44 = vsel %vm315_vm13, %v542_v38, %v543_v36 }
 0x191   : > { %v579_v45 = vrot.slane %v577_v42, 4  ;;  %v575_v46 = vpop.permute.xlu0 %574  ;;  %v546_v50 = vsel %vm545_vm4, %v539_v0, %v544_v44 }
 0x192   : > { %v578_v48 = vrot.slane %v575_v46, 4  ;;  %v548_v54 = vadd.f32 %v546_v50, %v512_v52 }
 0x194   : > { %v580_v51 = vsel %vm315_vm13, %v578_v48, %v579_v45 }
 0x195   : > { %v582_v53 = vsel %vm581_vm5, %v575_v46, %v580_v51 }
 0x196   : > { %v584_v55 = vadd.f32 %v582_v53, %v548_v54 }
 0x198   : > { %v624_v60 = vrot.slane %v584_v55, %v921_v15  ;;  %v628_v61 = vrot.slane %v584_v55, %v627_v56  ;;  %v595_v62 = vrot.slane %v584_v55, %v918_v14  ;;  %v599_v63 = vrot.slane %v584_v55, %v598_v57 }
 0x199   : > { %v653_v3 = vrot.slane %v584_v55, %v652_v58  ;;  %v657_v4 = vrot.slane %v584_v55, %v656_v59  ;;  %v682_v11 = vrot.slane %v584_v55, %v681_v1  ;;  %v686_v12 = vrot.slane %v584_v55, %v685_v2 }
 0x19a   : > { %v634_v6 = vrot.slane %v624_v60, %v921_v15  ;;  %v638_v7 = vrot.slane %v628_v61, %v921_v15  ;;  %v605_v8 = vrot.slane %v595_v62, %v918_v14  ;;  %v609_v9 = vrot.slane %v599_v63, %v918_v14 }
 0x19b   : > { %v663_v13 = vrot.slane %v653_v3, %v652_v58  ;;  %v667_v19 = vrot.slane %v657_v4, %v652_v58  ;;  %v692_v22 = vrot.slane %v682_v11, %v681_v1  ;;  %v696_v23 = vrot.slane %v686_v12, %v681_v1 }
 0x1a1   : > { %v619_v5 = vpop.permute.xlu1 %618 }
 0x1a2   : > { %v589_v10 = vpop.permute.xlu0 %588  ;;  %v639_v16 = vmul.f32 %v634_v6, %v619_v5  ;;  %v640_v17 = vmul.f32 %v638_v7, %v619_v5 }
 0x1a3   : > { %v610_v18 = vmul.f32 %v605_v8, %v589_v10  ;;  %v611_v20 = vmul.f32 %v609_v9, %v589_v10 }
 0x1a5   : > { %v677_v21 = vpop.permute.xlu1 %676  ;;  %v641_v25 = vadd.f32 %v639_v16, %v610_v18  ;;  %v642_v15 = vadd.f32 %v640_v17, %v611_v20 }
 0x1a6   : > { %v648_v24 = vpop.permute.xlu0 %647  ;;  %v697_v28 = vmul.f32 %v692_v22, %v677_v21  ;;  %v698_v14 = vmul.f32 %v696_v23, %v677_v21 }
 0x1a7   : > { %v668_v26 = vmul.f32 %v663_v13, %v648_v24  ;;  %v669_v27 = vmul.f32 %v667_v19, %v648_v24 }
 0x1a9   : > { %v670_v29 = vadd.f32 %v668_v26, %v641_v25  ;;  %v671_v30 = vadd.f32 %v669_v27, %v642_v15 }
 0x1aa   : > { %v705_v33 = vpop.permute.xlu0 %704 }
 0x1ab   : > { %v699_v31 = vadd.f32 %v697_v28, %v670_v29  ;;  %v700_v32 = vadd.f32 %v698_v14, %v671_v30 }
 0x1ad   : > { %v707_v34 = vadd.f32 %v705_v33, %v699_v31  ;;  %v708_v35 = vadd.f32 %v705_v33, %v700_v32 }
 0x1af   : > { %709 = vst [vmem:[%s224_s6] sm:$0xff] %v707_v34  ;;  %710 = vst [vmem:[%s224_s6 + $0x8] sm:$0xff] %v708_v35 }
 0x1b0 PF: > { %s15_s18 = sadd.s32 1, %s826_s18  }
 0x1b1   : > { %p12_p4 = scmp.ge.s32.totalorder %s15_s18, 4  }
 0x1b3   :  { %14 = sbr.rel (!%p12_p4) target bundleno = 1 (0x1), region = 83 }

// kernel: block1_forward.3
= control target key start
LH: loop header
LB: loop body
LE: loop exit
PB: predicated region body
PF: predicated region fallthrough
CT: control target
= control target key end

     0   :  { %s1203_s27 = smov 0   ;;  %s1447_s0 = inlined_call_operand.vmem [shape: f32[2,8,256], index: 0, kind: input, shape index: {}]   ;;  %s1448_s1 = inlined_call_operand.vmem [shape: f32[9,8,1], index: 1, kind: input, shape index: {}]   ;;  %s1449_s2 = inlined_call_operand.vmem [shape: f32[8,8,1], index: 2, kind: input, shape index: {}]   ;;  %s1450_s3 = inlined_call_operand.vmem [shape: f32[8,1], index: 3, kind: input, shape index: {}]   ;;  %s1451_s4 = inlined_call_operand.vmem [shape: f32[3,1,256], index: 4, kind: input, shape index: {}]   ;;  %s1452_s5 = inlined_call_operand.vmem [shape: f32[2,4,256], index: 5, kind: input, shape index: {}]   ;;  %s1453_s6 = inlined_call_operand.vmem [shape: f32[4,8,1], index: 6, kind: input, shape index: {}]   ;;  %s1454_s7 = inlined_call_operand.vmem [shape: f32[8,1], index: 7, kind: input, shape index: {}]   ;;  %s1455_s8 = inlined_call_operand.vmem [shape: f32[2,8,256], index: 8, kind: output, shape index: {}]  }
   0x1 LB: > { %s1068_s28 = sadd.s32 4294967295, %s1138_s27   ;;  %p1072_p0 = scmp.ge.s32.totalorder %s1138_s27, 1  ;;  %s1138_s27 = sphi %s1203_s27, %s18_s27  }
   0x2   : > { %p272_p1 = scmp.lt.s32.totalorder %s1138_s27, 3 }
   0x4   : > { %p273_p2 = pnand %p1072_p0, %p272_p1 }
   0x5   : > { %v1083_v0 = vld [vmem:[%s1448_s1 + $0x18] sm:$0xff] (!%p273_p2)  ;;  %v1079_v1 = vld [vmem:[%s1448_s1 + $0x8] sm:$0xff] (!%p273_p2)  ;;  %p311_p3 = scmp.lt.s32.totalorder (!%p273_p2), %s1068_s28, 1  ;;  %v1140_v2 = vmov (!%p273_p2), 0   ;;  %v1084_v3 = vld [vmem:[%s1448_s1 + $0x20] sm:$0xff] (!%p273_p2)  ;;  %s1141_s29 = smov (!%p273_p2), 17   ;;  %v359_v14 = vlaneseq (!%p273_p2) }
   0x6   : > { %276 = sbr.rel (%p273_p2) target bundleno = 459 (0x1cb), region = 52  ;;  %1131 = vset.pattern.permute.xlu1 (!%p273_p2), %v1140_v2  ;;  %1130 = vset.pattern.permute.xlu0 (!%p273_p2), %v1140_v2  ;;  %v1081_v4 = vld [vmem:[%s1448_s1 + $0x10] sm:$0xff] (!%p273_p2)  ;;  %v1085_v6 = vld [vmem:[%s1448_s1 + $0x28] sm:$0xff] (!%p273_p2)  ;;  %v1088_v7 = vld [vmem:[%s1448_s1 + $0x40] sm:$0xff] (!%p273_p2)  ;;  %vm332_vm0 = vcmask (!%p273_p2), 277504   ;;  %v1142_v13 = vmov (!%p273_p2), 0.0  }
   0x7   : > { %486 = vperm.xlu1 (!%p273_p2), %1131, %v1083_v0   ;;  %384 = vperm.xlu0 (!%p273_p2), %1130, %v1079_v1   ;;  %v1086_v5 = vld [vmem:[%s1448_s1 + $0x30] sm:$0xff] (!%p273_p2)  ;;  %v1087_v8 = vld [vmem:[%s1448_s1 + $0x38] sm:$0xff] (!%p273_p2)  ;;  %333 = vst.msk [vmem:[#allocation2 + $0x10] sm:$0xff] (!%p273_p2), %vm332_vm0, %v1142_v13  ;;  %330 = vst [vmem:[#allocation2] sm:$0xff] (!%p273_p2), %v1142_v13  ;;  %v1246_v15 = vshrl.u32 (!%p273_p2), %v359_v14, 7  ;;  %s1143_s14 = smov (!%p273_p2), 1  }
   0x8   : > { %v1080_v18 = vld [vmem:[%s1451_s4 + $0x2] sm:$0x3] (!%p273_p2)  ;;  %v1082_v21 = vld [vmem:[%s1451_s4 + $0x4] sm:$0x3] (!%p273_p2)  ;;  %v352_v23 = vld [vmem:[%s1451_s4] sm:$0x3] (!%p273_p2) }
   0x9   : > { %v1249_v16 = vsub.s32 (!%p273_p2), 0, %v1246_v15  ;;  %v1252_v17 = vsub.s32 (!%p273_p2), 1, %v1246_v15  ;;  %s1144_s16 = smov (!%p273_p2), 2   ;;  %s1145_s17 = smov (!%p273_p2), 16   ;;  %vm340_vm1 = vcmask (!%p273_p2), 138240   ;;  %vm345_vm2 = vcmask (!%p273_p2), 1047688  }
   0xa   : > { %s1146_s18 = smov (!%p273_p2), 18   ;;  %s1147_s19 = smov (!%p273_p2), 32   ;;  %v1089_v54 = vld [vmem:[%s1449_s2 + $0x8] sm:$0xff] (!%p273_p2)  ;;  %v351_v55 = vld [vmem:[%s1448_s1] sm:$0xff] (!%p273_p2)  ;;  %v1090_v56 = vld [vmem:[%s1449_s2 + $0x10] sm:$0xff] (!%p273_p2)  ;;  %vm458_vm3 = vcmask (!%p273_p2), 15360  }
   0xb   : > { %525 = vperm.xlu1 (!%p273_p2), %1131, %v1084_v3   ;;  %436 = vperm.xlu0 (!%p273_p2), %1130, %v1081_v4   ;;  %v391_v19 = vrot.slane (!%p273_p2), %v1080_v18, %v1249_v16  ;;  %v395_v20 = vrot.slane (!%p273_p2), %v1080_v18, %v1252_v17  ;;  %v443_v27 = vrot.slane (!%p273_p2), %v1082_v21, %v1249_v16  ;;  %s1148_s20 = smov (!%p273_p2), 33   ;;  %s1149_s21 = smov (!%p273_p2), 34   ;;  %v714_v57 = vld [vmem:[%s1449_s2] sm:$0xff] (!%p273_p2)  ;;  %vm406_vm4 = vcmask (!%p273_p2), 7168  }
   0xc   : > { %v447_v28 = vrot.slane (!%p273_p2), %v1082_v21, %v1252_v17  ;;  %v1268_v29 = vrot.slane (!%p273_p2), %v352_v23, %v1249_v16  ;;  %v1271_v30 = vrot.slane (!%p273_p2), %v352_v23, %v1252_v17  ;;  %s1150_s10 = smov (!%p273_p2), 127   ;;  %s1151_s11 = smov (!%p273_p2), 126   ;;  %vm497_vm5 = vcmask (!%p273_p2), 130048  }
   0xd   : > { %s1457_s28 = smov (!%p311_p3, %s1068_s28), 1  ;;  %s1152_s12 = smov 112   ;;  %vm613_vm6 = vcmask 261120   ;;  %vm574_vm7 = vcmask 146432   ;;  %vm652_vm8 = vcmask 269312   ;;  %vm423_vm9 = vcmask 1039360  }
   0xe   : > { %s1101_s15 = sshll.u32 %s1457_s28, 4  ;;  %s1153_s13 = smov 111   ;;  %vm475_vm10 = vcmask 1031168   ;;  %vm514_vm11 = vcmask 916480   ;;  %vm552_vm12 = vcmask 908288   ;;  %vm591_vm13 = vcmask 900096  }
   0xf   : > { %s315_s22 = scalar_lea.vmem %s1447_s0, %s1101_s15  ;;  %602 = vperm.xlu1 %1131, %v1086_v5   ;;  %563 = vperm.xlu0 %1130, %v1085_v6   ;;  %vm630_vm14 = vcmask 785408   ;;  %vm669_vm15 = vcmask 777216   ;;  %s325_s30 = scalar_lea.vmem %s1455_s8, %s1101_s15 }
  0x10   : > { %v327_v9 = vld [vmem:[%s315_s22 + $0x8] sm:$0xff]  ;;  %v326_v10 = vld [vmem:[%s315_s22] sm:$0xff]  ;;  %s1102_s22 = sshll.u32 %s1457_s28, 3 }
  0x11   : > { %v329_v11 = vmax.f32 %v327_v9, 0.0  ;;  %v328_v12 = vmax.f32 %v326_v10, 0.0  ;;  %s320_s25 = scalar_lea.vmem %s1452_s5, %s1102_s22 }
  0x13   : > { %680 = vperm.xlu1 %1131, %v1088_v7   ;;  %641 = vperm.xlu0 %1130, %v1087_v8  }
  0x17   : > { %338 = vrot.lane.b32.xlu1 %v329_v11, %s1141_s29  ;;  %336 = vrot.lane.b32.xlu0 %v328_v12, %s1141_s29 }
  0x86   : > { %v487_v22 = vpop.permute.xlu1 %486  ;;  %v385_v24 = vpop.permute.xlu0 %384 }
  0x87   : > { %v398_v25 = vmul.f32 %v391_v19, %v385_v24  ;;  %v399_v26 = vmul.f32 %v395_v20, %v385_v24  ;;  %v489_v35 = vmul.f32 %v487_v22, %v1268_v29  ;;  %v490_v36 = vmul.f32 %v487_v22, %v1271_v30 }
  0x89   : > { %404 = vrot.lane.b32.xlu1 %v399_v26, %s1143_s14  ;;  %402 = vrot.lane.b32.xlu0 %v398_v25, %s1143_s14  ;;  %s1154_s14 = smov 110  }
  0x8a   : > { %v526_v31 = vpop.permute.xlu1 %525  ;;  %v437_v32 = vpop.permute.xlu0 %436 }
  0x8b   : > { %v450_v33 = vmul.f32 %v443_v27, %v437_v32  ;;  %v451_v34 = vmul.f32 %v447_v28, %v437_v32  ;;  %v528_v41 = vmul.f32 %v526_v31, %v391_v19  ;;  %v529_v42 = vmul.f32 %v526_v31, %v395_v20 }
  0x8d   : > { %456 = vrot.lane.b32.xlu1 %v451_v34, %s1144_s16  ;;  %454 = vrot.lane.b32.xlu0 %v450_v33, %s1144_s16  ;;  %s1155_s16 = smov 96  }
  0x8e   : > { %v603_v37 = vpop.permute.xlu1 %602  ;;  %v564_v38 = vpop.permute.xlu0 %563 }
  0x8f   : > { %v566_v45 = vmul.f32 %v564_v38, %v443_v27  ;;  %v567_v46 = vmul.f32 %v564_v38, %v447_v28  ;;  %v605_v48 = vmul.f32 %v603_v37, %v1268_v29  ;;  %v606_v49 = vmul.f32 %v603_v37, %v1271_v30 }
  0x91   : > { %495 = vrot.lane.b32.xlu1 %v490_v36, %s1145_s17  ;;  %493 = vrot.lane.b32.xlu0 %v489_v35, %s1145_s17  ;;  %s1156_s17 = smov 95  }
  0x92   : > { %v681_v39 = vpop.permute.xlu1 %680  ;;  %v642_v40 = vpop.permute.xlu0 %641 }
  0x93   : > { %v644_v50 = vmul.f32 %v642_v40, %v391_v19  ;;  %v645_v51 = vmul.f32 %v642_v40, %v395_v20  ;;  %v683_v52 = vmul.f32 %v681_v39, %v443_v27  ;;  %v684_v53 = vmul.f32 %v681_v39, %v447_v28 }
  0x95   : > { %534 = vrot.lane.b32.xlu1 %v529_v42, %s1141_s29  ;;  %532 = vrot.lane.b32.xlu0 %v528_v41, %s1141_s29 }
  0x96   : > { %v339_v43 = vpop.permute.xlu1 %338  ;;  %v337_v44 = vpop.permute.xlu0 %336 }
  0x97   : > { %348 = vst.msk [vmem:[#allocation2 + $0x10] sm:$0xff] %vm340_vm1, %v339_v43  ;;  %v1279_v47 = vsel %vm340_vm1, %v337_v44, %v339_v43 }
  0x98   : > { %346 = vst.msk [vmem:[#allocation2] sm:$0xff] %vm345_vm2, %v337_v44 }
  0x99   : > { %572 = vrot.lane.b32.xlu1 %v567_v46, %s1146_s18  ;;  %570 = vrot.lane.b32.xlu0 %v566_v45, %s1146_s18  ;;  %s1157_s18 = smov 94  }
  0x9d   : > { %611 = vrot.lane.b32.xlu1 %v606_v49, %s1147_s19  ;;  %609 = vrot.lane.b32.xlu0 %v605_v48, %s1147_s19  ;;  %v1092_v49 = vld [vmem:[%s1449_s2 + $0x20] sm:$0xff] }
  0x9e   : > { %v377_v62 = vld [vmem:[#allocation2 + $0x10] sm:$0xff] }
  0x9f   : > { %v1295_v58 = vld [vmem:[#allocation2] sm:$0xff] }
  0xa1   : > { %650 = vrot.lane.b32.xlu1 %v645_v51, %s1148_s20  ;;  %648 = vrot.lane.b32.xlu0 %v644_v50, %s1148_s20  ;;  %v1091_v51 = vld [vmem:[%s1449_s2 + $0x18] sm:$0xff] }
  0xa5   : > { %689 = vrot.lane.b32.xlu1 %v684_v53, %s1149_s21  ;;  %687 = vrot.lane.b32.xlu0 %v683_v52, %s1149_s21  ;;  %v1094_v52 = vld [vmem:[%s1449_s2 + $0x30] sm:$0xff]  ;;  %v1093_v53 = vld [vmem:[%s1449_s2 + $0x28] sm:$0xff] }
  0xa9   : > { %736 = vperm.xlu1 %1131, %v1089_v54   ;;  %355 = vperm.xlu0 %1130, %v351_v55   ;;  %v865_v54 = vld [vmem:[%s1450_s3] sm:$0xff]  ;;  %v1095_v55 = vld [vmem:[%s1449_s2 + $0x38] sm:$0xff] }
  0xad   : > { %755 = vperm.xlu1 %1131, %v1090_v56   ;;  %717 = vperm.xlu0 %1130, %v714_v57   ;;  %v1096_v56 = vld [vmem:[%s1453_s6 + $0x8] sm:$0xff]  ;;  %v875_v57 = vld [vmem:[%s1453_s6] sm:$0xff] }
  0xfb   : > { %v405_v59 = vpop.permute.xlu1 %404  ;;  %v403_v60 = vpop.permute.xlu0 %402 }
  0xfc   : > { %v411_v61 = vmul.f32 %v403_v60, %v1295_v58  ;;  %v413_v1 = vmul.f32 %v405_v59, %v377_v62  ;;  %v407_v35 = vsel %vm406_vm4, %v403_v60, %v405_v59  ;;  %v1098_v59 = vld [vmem:[%s1453_s6 + $0x18] sm:$0xff]  ;;  %v1097_v60 = vld [vmem:[%s1453_s6 + $0x10] sm:$0xff] }
  0xfd   : > { %v412_v37 = vmul.f32 %v407_v35, %v1279_v47 }
  0xfe   : > { %417 = vrot.lane.b32.xlu1 %v411_v61, %s1150_s10  ;;  %v991_v61 = vld [vmem:[%s1454_s7] sm:$0xff] }
  0xff   : > { %v457_v63 = vpop.permute.xlu1 %456  ;;  %v455_v0 = vpop.permute.xlu0 %454 }
 0x100   : > { %v463_v2 = vmul.f32 %v455_v0, %v1295_v58  ;;  %v465_v5 = vmul.f32 %v457_v63, %v377_v62  ;;  %v459_v31 = vsel %vm458_vm3, %v455_v0, %v457_v63 }
 0x101   : > { %v464_v33 = vmul.f32 %v459_v31, %v1279_v47 }
 0x102   : > { %421 = vrot.lane.b32.xlu1 %v413_v1, %s1150_s10  ;;  %469 = vrot.lane.b32.xlu0 %v463_v2, %s1151_s11 }
 0x103   : > { %v496_v3 = vpop.permute.xlu1 %495  ;;  %v494_v4 = vpop.permute.xlu0 %493 }
 0x104   : > { %v502_v6 = vmul.f32 %v494_v4, %v1295_v58  ;;  %v504_v9 = vmul.f32 %v496_v3, %v377_v62  ;;  %v498_v39 = vsel %vm497_vm5, %v494_v4, %v496_v3 }
 0x105   : > { %v503_v41 = vmul.f32 %v498_v39, %v1279_v47 }
 0x106   : > { %473 = vrot.lane.b32.xlu0 %v465_v5, %s1151_s11  ;;  %508 = vrot.lane.b32.xlu1 %v502_v6, %s1152_s12 }
 0x107   : > { %v535_v7 = vpop.permute.xlu1 %534  ;;  %v533_v8 = vpop.permute.xlu0 %532 }
 0x108   : > { %v540_v10 = vmul.f32 %v533_v8, %v1295_v58  ;;  %v542_v13 = vmul.f32 %v535_v7, %v377_v62  ;;  %v536_v36 = vsel %vm340_vm1, %v533_v8, %v535_v7 }
 0x109   : > { %v541_v38 = vmul.f32 %v536_v36, %v1279_v47 }
 0x10a   : > { %512 = vrot.lane.b32.xlu1 %v504_v9, %s1152_s12  ;;  %546 = vrot.lane.b32.xlu0 %v540_v10, %s1153_s13 }
 0x10b   : > { %v573_v11 = vpop.permute.xlu1 %572  ;;  %v571_v12 = vpop.permute.xlu0 %570 }
 0x10c   : > { %v579_v14 = vmul.f32 %v571_v12, %v1295_v58  ;;  %v581_v20 = vmul.f32 %v573_v11, %v377_v62  ;;  %v575_v43 = vsel %vm574_vm7, %v571_v12, %v573_v11 }
 0x10d   : > { %v580_v45 = vmul.f32 %v575_v43, %v1279_v47 }
 0x10e   : > { %550 = vrot.lane.b32.xlu0 %v542_v13, %s1153_s13  ;;  %585 = vrot.lane.b32.xlu1 %v579_v14, %s1154_s14 }
 0x10f   : > { %v612_v18 = vpop.permute.xlu1 %611  ;;  %v610_v19 = vpop.permute.xlu0 %609 }
 0x110   : > { %v618_v21 = vmul.f32 %v610_v19, %v1295_v58  ;;  %v620_v24 = vmul.f32 %v612_v18, %v377_v62  ;;  %v614_v40 = vsel %vm613_vm6, %v610_v19, %v612_v18 }
 0x111   : > { %v619_v42 = vmul.f32 %v614_v40, %v1279_v47 }
 0x112   : > { %589 = vrot.lane.b32.xlu1 %v581_v20, %s1154_s14  ;;  %624 = vrot.lane.b32.xlu0 %v618_v21, %s1155_s16 }
 0x113   : > { %v651_v22 = vpop.permute.xlu1 %650  ;;  %v649_v23 = vpop.permute.xlu0 %648 }
 0x114   : > { %v657_v25 = vmul.f32 %v649_v23, %v1295_v58  ;;  %v659_v27 = vmul.f32 %v651_v22, %v377_v62  ;;  %v653_v48 = vsel %vm652_vm8, %v649_v23, %v651_v22 }
 0x115   : > { %v658_v50 = vmul.f32 %v653_v48, %v1279_v47 }
 0x116   : > { %628 = vrot.lane.b32.xlu0 %v620_v24, %s1155_s16  ;;  %663 = vrot.lane.b32.xlu1 %v657_v25, %s1156_s17 }
 0x117   : > { %v688_v26 = vpop.permute.xlu0 %687  ;;  %v690_v32 = vpop.permute.xlu1 %689 }
 0x118   : > { %v695_v28 = vmul.f32 %v688_v26, %v1295_v58  ;;  %v697_v34 = vmul.f32 %v690_v32, %v377_v62  ;;  %v691_v44 = vsel %vm332_vm0, %v688_v26, %v690_v32  ;;  %vm707_vm0 = vcmask 769024  }
 0x119   : > { %v696_v46 = vmul.f32 %v691_v44, %v1279_v47 }
 0x11a   : > { %667 = vrot.lane.b32.xlu1 %v659_v27, %s1156_s17  ;;  %701 = vrot.lane.b32.xlu0 %v695_v28, %s1157_s18 }
 0x11e   : > { %471 = vrot.lane.b32.xlu1 %v464_v33, %s1151_s11  ;;  %705 = vrot.lane.b32.xlu0 %v697_v34, %s1157_s18 }
 0x122   : > { %548 = vrot.lane.b32.xlu1 %v541_v38, %s1153_s13  ;;  %419 = vrot.lane.b32.xlu0 %v412_v37, %s1150_s10 }
 0x126   : > { %626 = vrot.lane.b32.xlu1 %v619_v42, %s1155_s16  ;;  %510 = vrot.lane.b32.xlu0 %v503_v41, %s1152_s12 }
 0x128   : > { %v1369_v62 = vpop.permute.xlu1 %736  ;;  %v356_v63 = vpop.permute.xlu0 %355 }
 0x129   : > { %v369_v20 = vmul.f32 %v1268_v29, %v356_v63  ;;  %v370_v21 = vmul.f32 %v1271_v30, %v356_v63 }
 0x12a   : > { %587 = vrot.lane.b32.xlu0 %v580_v45, %s1154_s14  ;;  %703 = vrot.lane.b32.xlu1 %v696_v46, %s1157_s18 }
 0x12b   : > { %v371_v24 = vmul.f32 %v1295_v58, %v369_v20  ;;  %v372_v25 = vmul.f32 %v370_v21, %v1279_v47 }
 0x12c   : > { %v1371_v0 = vpop.permute.xlu1 %755  ;;  %v1373_v1 = vpop.permute.xlu0 %717 }
 0x12e   : > { %665 = vrot.lane.b32.xlu0 %v658_v50, %s1156_s17  ;;  %793 = vperm.xlu1 %1131, %v1092_v49  }
 0x132   : > { %774 = vperm.xlu0 %1130, %v1091_v51   ;;  %831 = vperm.xlu1 %1131, %v1094_v52  }
 0x136   : > { %812 = vperm.xlu0 %1130, %v1093_v53   ;;  %868 = vperm.xlu1 %1131, %v865_v54  }
 0x13a   : > { %850 = vperm.xlu0 %1130, %v1095_v55   ;;  %908 = vperm.xlu1 %1131, %v1096_v56  }
 0x13e   : > { %878 = vperm.xlu0 %1130, %v875_v57   ;;  %966 = vperm.xlu1 %1131, %v1098_v59  }
 0x142   : > { %937 = vperm.xlu0 %1130, %v1097_v60  }
 0x146   : > { %994 = vperm.xlu0 %1130, %v991_v61  }
 0x170   : > { %v418_v2 = vpop.permute.xlu1 %417 }
 0x174   : > { %v422_v3 = vpop.permute.xlu1 %421  ;;  %v470_v4 = vpop.permute.xlu0 %469 }
 0x178   : > { %v509_v5 = vpop.permute.xlu1 %508  ;;  %v474_v6 = vpop.permute.xlu0 %473 }
 0x17c   : > { %v513_v7 = vpop.permute.xlu1 %512  ;;  %v547_v8 = vpop.permute.xlu0 %546 }
 0x180   : > { %v586_v9 = vpop.permute.xlu1 %585  ;;  %v551_v10 = vpop.permute.xlu0 %550 }
 0x184   : > { %v590_v11 = vpop.permute.xlu1 %589  ;;  %v625_v12 = vpop.permute.xlu0 %624 }
 0x188   : > { %v664_v13 = vpop.permute.xlu1 %663  ;;  %v629_v14 = vpop.permute.xlu0 %628 }
 0x18c   : > { %v668_v18 = vpop.permute.xlu1 %667  ;;  %v702_v19 = vpop.permute.xlu0 %701 }
 0x190   : > { %v472_v22 = vpop.permute.xlu1 %471  ;;  %v706_v23 = vpop.permute.xlu0 %705 }
 0x191   : > { %v476_v34 = vsel %vm475_vm10, %v470_v4, %v472_v22  ;;  %v477_v35 = vsel %vm475_vm10, %v472_v22, %v474_v6  ;;  %v873_v22 = vld [vmem:[%s320_s25] sm:$0xff] }
 0x194   : > { %v549_v26 = vpop.permute.xlu1 %548  ;;  %v420_v27 = vpop.permute.xlu0 %419 }
 0x195   : > { %v424_v28 = vsel %vm423_vm9, %v418_v2, %v420_v27  ;;  %v425_v31 = vsel %vm423_vm9, %v420_v27, %v422_v3  ;;  %v553_v47 = vsel %vm552_vm12, %v547_v8, %v549_v26  ;;  %v554_v41 = vsel %vm552_vm12, %v549_v26, %v551_v10 }
 0x196   : > { %v428_v32 = vadd.f32 %v424_v28, %v371_v24  ;;  %v429_v33 = vadd.f32 %v425_v31, %v372_v25  ;;  %v1392_v8 = vsub.s32 2, %v1246_v15  ;;  %v836_v31 = vsub.s32 6, %v1246_v15 }
 0x198   : > { %v480_v29 = vadd.f32 %v476_v34, %v428_v32  ;;  %v481_v30 = vadd.f32 %v477_v35, %v429_v33  ;;  %v511_v36 = vpop.permute.xlu0 %510  ;;  %v627_v39 = vpop.permute.xlu1 %626 }
 0x199   : > { %v515_v37 = vsel %vm514_vm11, %v509_v5, %v511_v36  ;;  %v516_v38 = vsel %vm514_vm11, %v511_v36, %v513_v7  ;;  %v631_v50 = vsel %vm630_vm14, %v625_v12, %v627_v39  ;;  %v632_v51 = vsel %vm630_vm14, %v627_v39, %v629_v14 }
 0x19a   : > { %v519_v58 = vadd.f32 %v515_v37, %v480_v29  ;;  %v520_v40 = vadd.f32 %v516_v38, %v481_v30  ;;  %v874_v36 = vmax.f32 %v873_v22, 0.0  ;;  %v855_v38 = vsub.s32 7, %v1246_v15 }
 0x19c   : > { %v557_v42 = vadd.f32 %v553_v47, %v519_v58  ;;  %v558_v43 = vadd.f32 %v554_v41, %v520_v40  ;;  %v588_v44 = vpop.permute.xlu0 %587  ;;  %v704_v52 = vpop.permute.xlu1 %703 }
 0x19d   : > { %v592_v45 = vsel %vm591_vm13, %v586_v9, %v588_v44  ;;  %v593_v46 = vsel %vm591_vm13, %v588_v44, %v590_v11  ;;  %v708_v61 = vsel %vm707_vm0, %v702_v19, %v704_v52  ;;  %v709_v63 = vsel %vm707_vm0, %v704_v52, %v706_v23 }
 0x19e   : > { %v596_v48 = vadd.f32 %v592_v45, %v557_v42  ;;  %v597_v49 = vadd.f32 %v593_v46, %v558_v43  ;;  %v798_v19 = vsub.s32 4, %v1246_v15  ;;  %v885_v44 = vrot.slane %v874_v36, %v1249_v16 }
 0x19f   : > { %v914_v52 = vrot.slane %v874_v36, %v1252_v17 }
 0x1a0   : > { %v635_v53 = vadd.f32 %v631_v50, %v596_v48  ;;  %v636_v54 = vadd.f32 %v632_v51, %v597_v49  ;;  %v666_v55 = vpop.permute.xlu0 %665  ;;  %v889_v45 = vrot.slane %v874_v36, %v798_v19 }
 0x1a1   : > { %v670_v56 = vsel %vm669_vm15, %v664_v13, %v666_v55  ;;  %v671_v57 = vsel %vm669_vm15, %v666_v55, %v668_v18  ;;  %v1404_v18 = vsub.s32 3, %v1246_v15 }
 0x1a2   : > { %v674_v59 = vadd.f32 %v670_v56, %v635_v53  ;;  %v675_v60 = vadd.f32 %v671_v57, %v636_v54 }
 0x1a4   : > { %v1379_v2 = vadd.f32 %v708_v61, %v674_v59  ;;  %v1381_v3 = vadd.f32 %v709_v63, %v675_v60  ;;  %v895_v61 = vrot.slane %v885_v44, %v1249_v16  ;;  %v899_v63 = vrot.slane %v889_v45, %v1249_v16 }
 0x1a6   : > { %v723_v4 = vrot.slane %v1379_v2, %v1249_v16  ;;  %v727_v5 = vrot.slane %v1381_v3, %v1249_v16  ;;  %v742_v6 = vrot.slane %v1379_v2, %v1252_v17  ;;  %v746_v7 = vrot.slane %v1381_v3, %v1252_v17 }
 0x1a7   : > { %v761_v13 = vrot.slane %v1379_v2, %v1392_v8  ;;  %v765_v14 = vrot.slane %v1381_v3, %v1392_v8  ;;  %v780_v25 = vrot.slane %v1379_v2, %v1404_v18  ;;  %v784_v26 = vrot.slane %v1381_v3, %v1404_v18 }
 0x1a8   : > { %v728_v9 = vmul.f32 %v723_v4, %v1373_v1  ;;  %v729_v10 = vmul.f32 %v727_v5, %v1373_v1  ;;  %v747_v11 = vmul.f32 %v742_v6, %v1369_v62  ;;  %v748_v12 = vmul.f32 %v746_v7, %v1369_v62 }
 0x1a9   : > { %v817_v62 = vsub.s32 5, %v1246_v15  ;;  %v766_v23 = vmul.f32 %v761_v13, %v1371_v0  ;;  %v767_v24 = vmul.f32 %v765_v14, %v1371_v0  ;;  %v799_v27 = vrot.slane %v1379_v2, %v798_v19 }
 0x1aa   : > { %v749_v20 = vadd.f32 %v747_v11, %v728_v9  ;;  %v750_v21 = vadd.f32 %v748_v12, %v729_v10  ;;  %v803_v28 = vrot.slane %v1381_v3, %v798_v19  ;;  %v837_v41 = vrot.slane %v1379_v2, %v836_v31 }
 0x1ab   : > { %v818_v0 = vrot.slane %v1379_v2, %v817_v62  ;;  %v822_v37 = vrot.slane %v1381_v3, %v817_v62  ;;  %v841_v42 = vrot.slane %v1381_v3, %v836_v31  ;;  %v918_v15 = vrot.slane %v874_v36, %v817_v62 }
 0x1ac   : > { %v768_v34 = vadd.f32 %v766_v23, %v749_v20  ;;  %v769_v35 = vadd.f32 %v767_v24, %v750_v21  ;;  %v856_v57 = vrot.slane %v1379_v2, %v855_v38  ;;  %v860_v59 = vrot.slane %v1381_v3, %v855_v38 }
 0x1ad   : > { %v794_v1 = vpop.permute.xlu1 %793  ;;  %v943_v6 = vrot.slane %v874_v36, %v1392_v8  ;;  %v947_v7 = vrot.slane %v874_v36, %v836_v31  ;;  %v972_v12 = vrot.slane %v874_v36, %v1404_v18  ;;  %v976_v13 = vrot.slane %v874_v36, %v855_v38 }
 0x1ae   : > { %v804_v39 = vmul.f32 %v799_v27, %v794_v1  ;;  %v805_v58 = vmul.f32 %v803_v28, %v794_v1  ;;  %v924_v2 = vrot.slane %v914_v52, %v1252_v17  ;;  %v928_v3 = vrot.slane %v918_v15, %v1252_v17 }
 0x1af   : > { %v953_v21 = vrot.slane %v943_v6, %v1392_v8  ;;  %v957_v62 = vrot.slane %v947_v7, %v1392_v8  ;;  %v982_v24 = vrot.slane %v972_v12, %v1404_v18 }
 0x1b1   : > { %v832_v32 = vpop.permute.xlu1 %831  ;;  %v775_v33 = vpop.permute.xlu0 %774 }
 0x1b2   : > { %v785_v29 = vmul.f32 %v780_v25, %v775_v33  ;;  %v786_v30 = vmul.f32 %v784_v26, %v775_v33  ;;  %v842_v53 = vmul.f32 %v837_v41, %v832_v32  ;;  %v843_v54 = vmul.f32 %v841_v42, %v832_v32 }
 0x1b3   : > { %v986_v25 = vrot.slane %v976_v13, %v1404_v18 }
 0x1b4   : > { %v787_v40 = vadd.f32 %v785_v29, %v768_v34  ;;  %v788_v47 = vadd.f32 %v786_v30, %v769_v35 }
 0x1b5   : > { %v813_v43 = vpop.permute.xlu0 %812  ;;  %v869_v46 = vpop.permute.xlu1 %868 }
 0x1b6   : > { %v806_v48 = vadd.f32 %v804_v39, %v787_v40  ;;  %v807_v49 = vadd.f32 %v805_v58, %v788_v47  ;;  %v823_v50 = vmul.f32 %v818_v0, %v813_v43  ;;  %v824_v51 = vmul.f32 %v822_v37, %v813_v43 }
 0x1b8   : > { %v825_v55 = vadd.f32 %v823_v50, %v806_v48  ;;  %v826_v56 = vadd.f32 %v824_v51, %v807_v49 }
 0x1b9   : > { %v851_v60 = vpop.permute.xlu0 %850  ;;  %v909_v11 = vpop.permute.xlu1 %908 }
 0x1ba   : > { %v844_v4 = vadd.f32 %v842_v53, %v825_v55  ;;  %v845_v5 = vadd.f32 %v843_v54, %v826_v56  ;;  %v861_v9 = vmul.f32 %v856_v57, %v851_v60  ;;  %v862_v10 = vmul.f32 %v860_v59, %v851_v60 }
 0x1bb   : > { %v929_v26 = vmul.f32 %v924_v2, %v909_v11  ;;  %v930_v27 = vmul.f32 %v928_v3, %v909_v11 }
 0x1bc   : > { %v863_v14 = vadd.f32 %v861_v9, %v844_v4  ;;  %v864_v19 = vadd.f32 %v862_v10, %v845_v5 }
 0x1bd   : > { %v879_v1 = vpop.permute.xlu0 %878  ;;  %v967_v32 = vpop.permute.xlu1 %966 }
 0x1be   : > { %v900_v20 = vmul.f32 %v895_v61, %v879_v1  ;;  %v901_v16 = vmul.f32 %v899_v63, %v879_v1  ;;  %v871_v22 = vadd.f32 %v869_v46, %v863_v14  ;;  %v872_v23 = vadd.f32 %v869_v46, %v864_v19 }
 0x1bf   : > { %v987_v30 = vmul.f32 %v982_v24, %v967_v32  ;;  %v988_v36 = vmul.f32 %v986_v25, %v967_v32 }
 0x1c0   : > { %v902_v28 = vadd.f32 %v900_v20, %v871_v22  ;;  %v903_v17 = vadd.f32 %v901_v16, %v872_v23 }
 0x1c1   : > { %v938_v31 = vpop.permute.xlu0 %937 }
 0x1c2   : > { %v958_v33 = vmul.f32 %v953_v21, %v938_v31  ;;  %v959_v34 = vmul.f32 %v957_v62, %v938_v31  ;;  %v931_v35 = vadd.f32 %v929_v26, %v902_v28  ;;  %v932_v29 = vadd.f32 %v930_v27, %v903_v17 }
 0x1c4   : > { %v960_v8 = vadd.f32 %v958_v33, %v931_v35  ;;  %v961_v0 = vadd.f32 %v959_v34, %v932_v29 }
 0x1c5   : > { %v995_v18 = vpop.permute.xlu0 %994 }
 0x1c6   : > { %v989_v37 = vadd.f32 %v987_v30, %v960_v8  ;;  %v990_v38 = vadd.f32 %v988_v36, %v961_v0 }
 0x1c8   : > { %v997_v39 = vadd.f32 %v995_v18, %v989_v37  ;;  %v998_v58 = vadd.f32 %v995_v18, %v990_v38 }
 0x1ca   : > { %999 = vst [vmem:[%s325_s30] sm:$0xff] %v997_v39  ;;  %1000 = vst [vmem:[%s325_s30 + $0x8] sm:$0xff] %v998_v58 }
 0x1cb PF: > { %s18_s27 = sadd.s32 1, %s1138_s27  }
 0x1cc   : > { %p15_p4 = scmp.ge.s32.totalorder %s18_s27, 4  }
 0x1ce   :  { %17 = sbr.rel (!%p15_p4) target bundleno = 1 (0x1), region = 105 }

</bundles_post_ra>
